<compile_context>
chip_gen: v6e
topology: v6e:2x2x1
jax: 0.10.0
libtpu: 0.0.40
codegen_flags: <defaults>
</compile_context>

<pallas_src>
import functools

import jax
import jax.numpy as jnp
from jax import lax
from jax.experimental import pallas as pl
from jax.experimental.pallas import tpu as pltpu

EPS = 1e-5                      # PyTorch InstanceNorm2d default eps
ACT_DTYPE = jnp.bfloat16        # storage dtype for weights / inter-layer activations
VMEM_LIMIT = 32 * 1024 * 1024
LANE = 128                      # lane width
SUB = 16                        # bf16 sublane tile


def _round_up(x, m):
    return (x + m - 1) // m * m


# ----------------------------------------------------------------------------
# Pallas kernel: fused (single-matmul) conv + bias + InstanceNorm
# + 2x2 avg-pool (as a matmul) + residual add + activation.
# One image per grid step, lane-dense (Cout_pad, M_pad) output.
# ----------------------------------------------------------------------------
def _conv_kernel(x_ref, w_ref, b_ref, *rest, count, apply_norm, act,
                 has_pool, has_res):
    # x_ref : (1, K_pad, M_pad)      im2col operand (zero-padded), bf16
    # w_ref : (Cout_pad, K_pad)      folded weights, bf16
    # b_ref : (Cout_pad, 1)          bias, f32 (used only when apply_norm=False)
    # rest  : [pool_ref (M_pad, Mo_pad)], [res_ref (1, Cout_pad, Mo_pad)], o_ref
    idx = 0
    pool_ref = None
    res_ref = None
    if has_pool:
        pool_ref = rest[idx]
        idx += 1
    if has_res:
        res_ref = rest[idx]
        idx += 1
    o_ref = rest[idx]

    # Whole conv as one MXU matmul (K = k*k*Cin folded into the contraction).
    acc = jnp.dot(w_ref[...], x_ref[0],
                  preferred_element_type=jnp.float32)        # (Cout_pad, M_pad) f32

    if not apply_norm:
        # Bias only matters when there is no InstanceNorm (IN cancels it).
        acc = acc + b_ref[...]                               # (Cout_pad, 1) bcast

    if apply_norm:
        # InstanceNorm2d (affine=False).  Lane-padding columns of the operand
        # are zero, so acc there is exactly 0 and contributes nothing to the
        # sums; divide by the valid count only.
        inv_cnt = 1.0 / float(count)
        s1 = jnp.sum(acc, axis=1, keepdims=True)             # (Cout_pad, 1)
        s2 = jnp.sum(acc * acc, axis=1, keepdims=True)
        mean = s1 * inv_cnt
        var = jnp.maximum(s2 * inv_cnt - mean * mean, 0.0)
        acc = (acc - mean) * lax.rsqrt(var + EPS)

    if act == "relu":
        acc = jnp.maximum(acc, 0.0)

    if has_pool:
        # Fused 2x2 average pool: post-ReLU values never leave VMEM at full
        # resolution.  P has zero rows for lane-padding columns.
        acc = jnp.dot(acc, pool_ref[...],
                      preferred_element_type=jnp.float32)    # (Cout_pad, Mo_pad)

    if has_res:
        acc = acc + res_ref[0].astype(jnp.float32)           # ResnetBlock skip

    if act == "tanh":
        acc = jnp.tanh(acc)

    o_ref[0] = acc.astype(o_ref.dtype)


# ----------------------------------------------------------------------------
# Wrapper: wrapper-side im2col / padding glue + pallas_call.
# ----------------------------------------------------------------------------
def conv_block(x, w, b, *, k, pad_mode, norm, act, pool=False, residual=None,
               out_dtype=ACT_DTYPE):
    """Fused Conv2d(kxk, stride 1, 'same') [+ InstanceNorm] [+ ReLU]
    [+ 2x2 avg-pool] [+ residual] [+ Tanh].

    x        : [N, Cin, H, W]      (any float dtype; stored as bf16 operand)
    w        : [Cout, Cin, k, k]   PyTorch conv weight layout
    b        : [Cout]              conv bias
    residual : optional [N, Cout, H, W] added after the (optional) norm.
    Returns  : [N, Cout, Ho, Wo]   (Ho,Wo = H,W, halved when pool=True)
    """
    N, Cin, H, W = x.shape
    Cout = w.shape[0]
    pad = (k - 1) // 2
    M = H * W
    M_pad = max(LANE, _round_up(M, LANE))
    K = k * k * Cin
    K_pad = _round_up(K, SUB)
    Cout_pad = _round_up(Cout, 8)

    # --- im2col operand: fold all k*k offsets into the contraction dim ------
    mode = "reflect" if pad_mode == "reflect" else "constant"
    xp = jnp.pad(x, ((0, 0), (0, 0), (pad, pad), (pad, pad)), mode=mode)
    cols = []
    for di in range(k):
        for dj in range(k):
            cols.append(xp[:, :, di:di + H, dj:dj + W])       # (N, Cin, H, W)
    patches = jnp.stack(cols, axis=1)                         # (N, k*k, Cin, H, W)
    op = patches.reshape(N, K, M)
    op = jnp.pad(op, ((0, 0), (0, K_pad - K), (0, M_pad - M))).astype(ACT_DTYPE)

    # --- weights / bias, folded & padded to MXU-friendly shapes -------------
    wmat = jnp.transpose(w, (0, 2, 3, 1)).reshape(Cout, K)    # rows match op rows
    wmat = jnp.pad(wmat, ((0, Cout_pad - Cout), (0, K_pad - K))).astype(ACT_DTYPE)
    bvec = jnp.pad(b, (0, Cout_pad - Cout)).reshape(Cout_pad, 1).astype(jnp.float32)

    # --- optional fused 2x2 avg-pool matrix ---------------------------------
    if pool:
        Ho, Wo = H // 2, W // 2
        Mo = Ho * Wo
        Mo_pad = max(LANE, _round_up(Mo, LANE))
        rows = jnp.arange(M_pad, dtype=jnp.int32)
        hh, ww = rows // W, rows % W
        valid = rows < M
        col = (hh // 2) * Wo + (ww // 2)
        P = ((col[:, None] == jnp.arange(Mo_pad, dtype=jnp.int32)[None, :])
             & valid[:, None]).astype(jnp.float32) * 0.25
    else:
        Ho, Wo, Mo, Mo_pad, P = H, W, M, M_pad, None

    # --- optional residual (already in the output spatial size) -------------
    if residual is not None:
        res = residual.reshape(N, Cout, M).astype(ACT_DTYPE)
        res = jnp.pad(res, ((0, 0), (0, Cout_pad - Cout), (0, Mo_pad - M)))
    else:
        res = None

    inputs = [op, wmat, bvec]
    in_specs = [
        pl.BlockSpec((1, K_pad, M_pad), lambda n: (n, 0, 0)),
        pl.BlockSpec((Cout_pad, K_pad), lambda n: (0, 0)),
        pl.BlockSpec((Cout_pad, 1), lambda n: (0, 0)),
    ]
    if pool:
        inputs.append(P)
        in_specs.append(pl.BlockSpec((M_pad, Mo_pad), lambda n: (0, 0)))
    if res is not None:
        inputs.append(res)
        in_specs.append(pl.BlockSpec((1, Cout_pad, Mo_pad), lambda n: (n, 0, 0)))

    kernel = functools.partial(
        _conv_kernel, count=M, apply_norm=norm, act=act,
        has_pool=pool, has_res=res is not None)

    y = pl.pallas_call(
        kernel,
        out_shape=jax.ShapeDtypeStruct((N, Cout_pad, Mo_pad), out_dtype),
        grid=(N,),
        in_specs=in_specs,
        out_specs=pl.BlockSpec((1, Cout_pad, Mo_pad), lambda n: (n, 0, 0)),
        compiler_params=pltpu.CompilerParams(
            dimension_semantics=("parallel",),
            vmem_limit_bytes=VMEM_LIMIT),
    )(*inputs)

    # Drop pad channels / pad columns (cheap XLA slice that fuses into the
    # next layer's im2col gather).
    return y[:, :Cout, :Mo].reshape(N, Cout, Ho, Wo)


# ----------------------------------------------------------------------------
# Plain-JAX upsample glue.
# TODO(synk): Upsample/Downsample module definitions were not provided in the
# source; Downsample is implemented as a fused 2x2 average pool (inside the
# conv kernel) and Upsample as 2x nearest-neighbour replication.
# ----------------------------------------------------------------------------
def upsample2x(x):
    N, C, H, W = x.shape
    y = jnp.broadcast_to(x[:, :, :, None, :, None], (N, C, H, 2, W, 2))
    return y.reshape(N, C, 2 * H, 2 * W)


# ----------------------------------------------------------------------------
# Parameter construction (deterministic, synthetic).  PyTorch conv layout.
# ----------------------------------------------------------------------------
def _init_conv(key, cin, cout, k, scale=0.05):
    kw, kb = jax.random.split(key)
    w = scale * jax.random.normal(kw, (cout, cin, k, k), jnp.float32)
    b = scale * jax.random.normal(kb, (cout,), jnp.float32)
    return w, b


def init_generator_params(key, in_channels=3, features=8, residuals=2):
    keys = jax.random.split(key, 7 + 2 * residuals)
    params = {
        "block1": _init_conv(keys[0], in_channels, features, 7),
        "down2": _init_conv(keys[1], features, features * 2, 3),
        "down3": _init_conv(keys[2], features * 2, features * 4, 3),
        "res": [
            (
                _init_conv(keys[3 + 2 * i], features * 4, features * 4, 3),
                _init_conv(keys[4 + 2 * i], features * 4, features * 4, 3),
            )
            for i in range(residuals)
        ],
        "up5": _init_conv(keys[3 + 2 * residuals], features * 4, features * 2, 3),
        "up6": _init_conv(keys[4 + 2 * residuals], features * 2, features, 3),
        "block7": _init_conv(keys[5 + 2 * residuals], features, in_channels, 7),
    }
    return params


# ----------------------------------------------------------------------------
# Generator forward (encode_only=False path).  Channels-first throughout.
# ----------------------------------------------------------------------------
def generator_forward(x_nchw, params):
    x = x_nchw

    # block1: ReflectionPad(3) + Conv7 + IN + ReLU
    w, b = params["block1"]
    x = conv_block(x, w, b, k=7, pad_mode="reflect", norm=True, act="relu")

    # downsampleblock2/3: Conv3(pad=1) + IN + ReLU + Downsample (fused pool)
    w, b = params["down2"]
    x = conv_block(x, w, b, k=3, pad_mode="zero", norm=True, act="relu", pool=True)
    w, b = params["down3"]
    x = conv_block(x, w, b, k=3, pad_mode="zero", norm=True, act="relu", pool=True)

    # resnetblocks4: x + [ReflPad(1)+Conv3+IN+ReLU+ReflPad(1)+Conv3+IN]
    # (the residual add is fused into the second conv kernel's epilogue)
    for (w1, b1), (w2, b2) in params["res"]:
        h = conv_block(x, w1, b1, k=3, pad_mode="reflect", norm=True, act="relu")
        x = conv_block(h, w2, b2, k=3, pad_mode="reflect", norm=True, act="none",
                       residual=x)

    # upsampleblock5/6: Upsample + Conv3(pad=1) + IN + ReLU
    x = upsample2x(x)
    w, b = params["up5"]
    x = conv_block(x, w, b, k=3, pad_mode="zero", norm=True, act="relu")
    x = upsample2x(x)
    w, b = params["up6"]
    x = conv_block(x, w, b, k=3, pad_mode="zero", norm=True, act="relu")

    # block7: ReflectionPad(3) + Conv7 + Tanh (bias, no norm), f32 output
    w, b = params["block7"]
    x = conv_block(x, w, b, k=7, pad_mode="reflect", norm=False, act="tanh",
                   out_dtype=jnp.float32)
    return x


if __name__ == "__main__":
    key = jax.random.PRNGKey(0)
    k_x, k_p = jax.random.split(key)

    # Small, module-consistent shapes: batch=2, in_channels=3, spatial=16x16,
    # features=8, residuals=2.
    x = jax.random.normal(k_x, (2, 3, 16, 16), jnp.float32)
    params = init_generator_params(k_p, in_channels=3, features=8, residuals=2)

    fwd = jax.jit(generator_forward)
    y = fwd(x, params)
    jax.block_until_ready(y)

    assert y.shape == (2, 3, 16, 16), y.shape
    assert bool(jnp.all(jnp.isfinite(y)))
    assert bool(jnp.all(jnp.abs(y) <= 1.0 + 1e-5))  # tanh output range
    print("KERNEL_OK")
</pallas_src>

<mosaic_0001>
module attributes {stable_mosaic.version = 11 : i64} {
  func.func @_conv_kernel(%arg0: i32, %arg1: memref<1x160x256xbf16, #tpu.memory_space<vmem>>, %arg2: memref<8x160xbf16, #tpu.memory_space<vmem>>, %arg3: memref<8x1xf32, #tpu.memory_space<vmem>>, %arg4: memref<1x8x256xbf16, #tpu.memory_space<vmem>>) attributes {dimension_semantics = [#tpu.dimension_semantics<parallel>], iteration_bounds = array<i64: 2>, scalar_prefetch = 0 : i64, scratch_operands = 0 : i64, tpu.core_type = #tpu.core_type<tc>, window_params = [{transform_indices = @transform_0, window_bounds = array<i64: 1, 160, 256>}, {pipeline_mode = #tpu.pipeline_mode<synchronous>, transform_indices = @transform_1, window_bounds = array<i64: 8, 160>}, {pipeline_mode = #tpu.pipeline_mode<synchronous>, transform_indices = @transform_2, window_bounds = array<i64: 8, 1>}, {transform_indices = @transform_3, window_bounds = array<i64: 1, 8, 256>}]} {
    %c0 = arith.constant 0 : index
    %c0_0 = arith.constant 0 : index
    %0 = vector.load %arg2[%c0, %c0_0] : memref<8x160xbf16, #tpu.memory_space<vmem>>, vector<8x160xbf16>
    %c0_1 = arith.constant 0 : index
    %c0_2 = arith.constant 0 : index
    %c0_3 = arith.constant 0 : index
    %1 = vector.load %arg1[%c0_1, %c0_2, %c0_3] : memref<1x160x256xbf16, #tpu.memory_space<vmem>>, vector<1x160x256xbf16>
    %2 = vector.shape_cast %1 : vector<1x160x256xbf16> to vector<160x256xbf16>
    %cst = arith.constant dense<0.000000e+00> : vector<8x256xf32>
    %3 = tpu.matmul %0, %2, %cst {dimension_numbers = #tpu.dot_dimension_numbers<[1], [0], [0], [1], [0, 0, 1, 1], [], []>} : vector<8x160xbf16>, vector<160x256xbf16>, vector<8x256xf32> -> vector<8x256xf32>
    %cst_4 = arith.constant dense<0.000000e+00> : vector<8xf32>
    %4 = vector.multi_reduction <add>, %3, %cst_4 [1] : vector<8x256xf32> to vector<8xf32>
    %5 = vector.shape_cast %4 : vector<8xf32> to vector<8x1xf32>
    %6 = arith.mulf %3, %3 : vector<8x256xf32>
    %cst_5 = arith.constant dense<0.000000e+00> : vector<8xf32>
    %7 = vector.multi_reduction <add>, %6, %cst_5 [1] : vector<8x256xf32> to vector<8xf32>
    %8 = vector.shape_cast %7 : vector<8xf32> to vector<8x1xf32>
    %cst_6 = arith.constant 3.906250e-03 : f32
    %9 = vector.broadcast %cst_6 : f32 to vector<8x1xf32>
    %10 = arith.mulf %5, %9 : vector<8x1xf32>
    %cst_7 = arith.constant 3.906250e-03 : f32
    %11 = vector.broadcast %cst_7 : f32 to vector<8x1xf32>
    %12 = arith.mulf %8, %11 : vector<8x1xf32>
    %13 = arith.mulf %10, %10 : vector<8x1xf32>
    %14 = arith.subf %12, %13 : vector<8x1xf32>
    %cst_8 = arith.constant 0.000000e+00 : f32
    %15 = vector.broadcast %cst_8 : f32 to vector<8x1xf32>
    %16 = arith.maximumf %14, %15 : vector<8x1xf32>
    %17 = vector.broadcast %10 : vector<8x1xf32> to vector<8x256xf32>
    %18 = arith.subf %3, %17 : vector<8x256xf32>
    %cst_9 = arith.constant 9.99999974E-6 : f32
    %19 = vector.broadcast %cst_9 : f32 to vector<8x1xf32>
    %20 = arith.addf %16, %19 : vector<8x1xf32>
    %21 = math.rsqrt %20 : vector<8x1xf32>
    %22 = vector.broadcast %21 : vector<8x1xf32> to vector<8x256xf32>
    %23 = arith.mulf %18, %22 : vector<8x256xf32>
    %cst_10 = arith.constant 0.000000e+00 : f32
    %24 = vector.broadcast %cst_10 : f32 to vector<8x256xf32>
    %25 = arith.maximumf %23, %24 : vector<8x256xf32>
    %26 = arith.truncf %25 : vector<8x256xf32> to vector<8x256xbf16>
    %c0_11 = arith.constant 0 : index
    %c0_12 = arith.constant 0 : index
    %c0_13 = arith.constant 0 : index
    %27 = vector.load %arg4[%c0_11, %c0_12, %c0_13] : memref<1x8x256xbf16, #tpu.memory_space<vmem>>, vector<1x8x256xbf16>
    %28 = vector.shape_cast %27 : vector<1x8x256xbf16> to vector<8x256xbf16>
    %29 = vector.shape_cast %26 : vector<8x256xbf16> to vector<1x8x256xbf16>
    tpu.vector_store %arg4[%c0_11, %c0_12, %c0_13], %29 {strides = array<i32>} : memref<1x8x256xbf16, #tpu.memory_space<vmem>>, vector<1x8x256xbf16>,
    return
  }
  func.func @transform_0(%arg0: i32) -> (i32, i32, i32) {
    %c0_i32 = arith.constant 0 : i32
    %c0_i32_0 = arith.constant 0 : i32
    %c0_i32_1 = arith.constant 0 : i32
    return %arg0, %c0_i32, %c0_i32_0 : i32, i32, i32
  }
  func.func @transform_1(%arg0: i32) -> (i32, i32) {
    %c0_i32 = arith.constant 0 : i32
    %c0_i32_0 = arith.constant 0 : i32
    %c0_i32_1 = arith.constant 0 : i32
    return %c0_i32, %c0_i32_0 : i32, i32
  }
  func.func @transform_2(%arg0: i32) -> (i32, i32) {
    %c0_i32 = arith.constant 0 : i32
    %c0_i32_0 = arith.constant 0 : i32
    %c0_i32_1 = arith.constant 0 : i32
    return %c0_i32, %c0_i32_0 : i32, i32
  }
  func.func @transform_3(%arg0: i32) -> (i32, i32, i32) {
    %c0_i32 = arith.constant 0 : i32
    %c0_i32_0 = arith.constant 0 : i32
    %c0_i32_1 = arith.constant 0 : i32
    return %arg0, %c0_i32, %c0_i32_0 : i32, i32, i32
  }
}

module attributes {stable_mosaic.version = 11 : i64} {
  func.func @_conv_kernel(%arg0: i32, %arg1: memref<1x80x256xbf16, #tpu.memory_space<vmem>>, %arg2: memref<16x80xbf16, #tpu.memory_space<vmem>>, %arg3: memref<16x1xf32, #tpu.memory_space<vmem>>, %arg4: memref<256x128xf32, #tpu.memory_space<vmem>>, %arg5: memref<1x16x128xbf16, #tpu.memory_space<vmem>>) attributes {dimension_semantics = [#tpu.dimension_semantics<parallel>], iteration_bounds = array<i64: 2>, scalar_prefetch = 0 : i64, scratch_operands = 0 : i64, tpu.core_type = #tpu.core_type<tc>, window_params = [{transform_indices = @transform_0, window_bounds = array<i64: 1, 80, 256>}, {pipeline_mode = #tpu.pipeline_mode<synchronous>, transform_indices = @transform_1, window_bounds = array<i64: 16, 80>}, {pipeline_mode = #tpu.pipeline_mode<synchronous>, transform_indices = @transform_2, window_bounds = array<i64: 16, 1>}, {pipeline_mode = #tpu.pipeline_mode<synchronous>, transform_indices = @transform_3, window_bounds = array<i64: 256, 128>}, {transform_indices = @transform_4, window_bounds = array<i64: 1, 16, 128>}]} {
    %c0 = arith.constant 0 : index
    %c0_0 = arith.constant 0 : index
    %0 = vector.load %arg2[%c0, %c0_0] : memref<16x80xbf16, #tpu.memory_space<vmem>>, vector<16x80xbf16>
    %c0_1 = arith.constant 0 : index
    %c0_2 = arith.constant 0 : index
    %c0_3 = arith.constant 0 : index
    %1 = vector.load %arg1[%c0_1, %c0_2, %c0_3] : memref<1x80x256xbf16, #tpu.memory_space<vmem>>, vector<1x80x256xbf16>
    %2 = vector.shape_cast %1 : vector<1x80x256xbf16> to vector<80x256xbf16>
    %cst = arith.constant dense<0.000000e+00> : vector<16x256xf32>
    %3 = tpu.matmul %0, %2, %cst {dimension_numbers = #tpu.dot_dimension_numbers<[1], [0], [0], [1], [0, 0, 1, 1], [], []>} : vector<16x80xbf16>, vector<80x256xbf16>, vector<16x256xf32> -> vector<16x256xf32>
    %cst_4 = arith.constant dense<0.000000e+00> : vector<16xf32>
    %4 = vector.multi_reduction <add>, %3, %cst_4 [1] : vector<16x256xf32> to vector<16xf32>
    %5 = vector.shape_cast %4 : vector<16xf32> to vector<16x1xf32>
    %6 = arith.mulf %3, %3 : vector<16x256xf32>
    %cst_5 = arith.constant dense<0.000000e+00> : vector<16xf32>
    %7 = vector.multi_reduction <add>, %6, %cst_5 [1] : vector<16x256xf32> to vector<16xf32>
    %8 = vector.shape_cast %7 : vector<16xf32> to vector<16x1xf32>
    %cst_6 = arith.constant 3.906250e-03 : f32
    %9 = vector.broadcast %cst_6 : f32 to vector<16x1xf32>
    %10 = arith.mulf %5, %9 : vector<16x1xf32>
    %cst_7 = arith.constant 3.906250e-03 : f32
    %11 = vector.broadcast %cst_7 : f32 to vector<16x1xf32>
    %12 = arith.mulf %8, %11 : vector<16x1xf32>
    %13 = arith.mulf %10, %10 : vector<16x1xf32>
    %14 = arith.subf %12, %13 : vector<16x1xf32>
    %cst_8 = arith.constant 0.000000e+00 : f32
    %15 = vector.broadcast %cst_8 : f32 to vector<16x1xf32>
    %16 = arith.maximumf %14, %15 : vector<16x1xf32>
    %17 = vector.broadcast %10 : vector<16x1xf32> to vector<16x256xf32>
    %18 = arith.subf %3, %17 : vector<16x256xf32>
    %cst_9 = arith.constant 9.99999974E-6 : f32
    %19 = vector.broadcast %cst_9 : f32 to vector<16x1xf32>
    %20 = arith.addf %16, %19 : vector<16x1xf32>
    %21 = math.rsqrt %20 : vector<16x1xf32>
    %22 = vector.broadcast %21 : vector<16x1xf32> to vector<16x256xf32>
    %23 = arith.mulf %18, %22 : vector<16x256xf32>
    %cst_10 = arith.constant 0.000000e+00 : f32
    %24 = vector.broadcast %cst_10 : f32 to vector<16x256xf32>
    %25 = arith.maximumf %23, %24 : vector<16x256xf32>
    %c0_11 = arith.constant 0 : index
    %c0_12 = arith.constant 0 : index
    %26 = vector.load %arg4[%c0_11, %c0_12] : memref<256x128xf32, #tpu.memory_space<vmem>>, vector<256x128xf32>
    %cst_13 = arith.constant dense<0.000000e+00> : vector<16x128xf32>
    %27 = tpu.matmul %25, %26, %cst_13 {dimension_numbers = #tpu.dot_dimension_numbers<[1], [0], [0], [1], [0, 0, 1, 1], [], []>} : vector<16x256xf32>, vector<256x128xf32>, vector<16x128xf32> -> vector<16x128xf32>
    %28 = arith.truncf %27 : vector<16x128xf32> to vector<16x128xbf16>
    %c0_14 = arith.constant 0 : index
    %c0_15 = arith.constant 0 : index
    %c0_16 = arith.constant 0 : index
    %29 = vector.load %arg5[%c0_14, %c0_15, %c0_16] : memref<1x16x128xbf16, #tpu.memory_space<vmem>>, vector<1x16x128xbf16>
    %30 = vector.shape_cast %29 : vector<1x16x128xbf16> to vector<16x128xbf16>
    %31 = vector.shape_cast %28 : vector<16x128xbf16> to vector<1x16x128xbf16>
    tpu.vector_store %arg5[%c0_14, %c0_15, %c0_16], %31 {strides = array<i32>} : memref<1x16x128xbf16, #tpu.memory_space<vmem>>, vector<1x16x128xbf16>,
    return
  }
  func.func @transform_0(%arg0: i32) -> (i32, i32, i32) {
    %c0_i32 = arith.constant 0 : i32
    %c0_i32_0 = arith.constant 0 : i32
    %c0_i32_1 = arith.constant 0 : i32
    return %arg0, %c0_i32, %c0_i32_0 : i32, i32, i32
  }
  func.func @transform_1(%arg0: i32) -> (i32, i32) {
    %c0_i32 = arith.constant 0 : i32
    %c0_i32_0 = arith.constant 0 : i32
    %c0_i32_1 = arith.constant 0 : i32
    return %c0_i32, %c0_i32_0 : i32, i32
  }
  func.func @transform_2(%arg0: i32) -> (i32, i32) {
    %c0_i32 = arith.constant 0 : i32
    %c0_i32_0 = arith.constant 0 : i32
    %c0_i32_1 = arith.constant 0 : i32
    return %c0_i32, %c0_i32_0 : i32, i32
  }
  func.func @transform_3(%arg0: i32) -> (i32, i32) {
    %c0_i32 = arith.constant 0 : i32
    %c0_i32_0 = arith.constant 0 : i32
    %c0_i32_1 = arith.constant 0 : i32
    return %c0_i32, %c0_i32_0 : i32, i32
  }
  func.func @transform_4(%arg0: i32) -> (i32, i32, i32) {
    %c0_i32 = arith.constant 0 : i32
    %c0_i32_0 = arith.constant 0 : i32
    %c0_i32_1 = arith.constant 0 : i32
    return %arg0, %c0_i32, %c0_i32_0 : i32, i32, i32
  }
}

module attributes {stable_mosaic.version = 11 : i64} {
  func.func @_conv_kernel(%arg0: i32, %arg1: memref<1x144x128xbf16, #tpu.memory_space<vmem>>, %arg2: memref<32x144xbf16, #tpu.memory_space<vmem>>, %arg3: memref<32x1xf32, #tpu.memory_space<vmem>>, %arg4: memref<128x128xf32, #tpu.memory_space<vmem>>, %arg5: memref<1x32x128xbf16, #tpu.memory_space<vmem>>) attributes {dimension_semantics = [#tpu.dimension_semantics<parallel>], iteration_bounds = array<i64: 2>, scalar_prefetch = 0 : i64, scratch_operands = 0 : i64, tpu.core_type = #tpu.core_type<tc>, window_params = [{transform_indices = @transform_0, window_bounds = array<i64: 1, 144, 128>}, {pipeline_mode = #tpu.pipeline_mode<synchronous>, transform_indices = @transform_1, window_bounds = array<i64: 32, 144>}, {pipeline_mode = #tpu.pipeline_mode<synchronous>, transform_indices = @transform_2, window_bounds = array<i64: 32, 1>}, {pipeline_mode = #tpu.pipeline_mode<synchronous>, transform_indices = @transform_3, window_bounds = array<i64: 128, 128>}, {transform_indices = @transform_4, window_bounds = array<i64: 1, 32, 128>}]} {
    %c0 = arith.constant 0 : index
    %c0_0 = arith.constant 0 : index
    %0 = vector.load %arg2[%c0, %c0_0] : memref<32x144xbf16, #tpu.memory_space<vmem>>, vector<32x144xbf16>
    %c0_1 = arith.constant 0 : index
    %c0_2 = arith.constant 0 : index
    %c0_3 = arith.constant 0 : index
    %1 = vector.load %arg1[%c0_1, %c0_2, %c0_3] : memref<1x144x128xbf16, #tpu.memory_space<vmem>>, vector<1x144x128xbf16>
    %2 = vector.shape_cast %1 : vector<1x144x128xbf16> to vector<144x128xbf16>
    %cst = arith.constant dense<0.000000e+00> : vector<32x128xf32>
    %3 = tpu.matmul %0, %2, %cst {dimension_numbers = #tpu.dot_dimension_numbers<[1], [0], [0], [1], [0, 0, 1, 1], [], []>} : vector<32x144xbf16>, vector<144x128xbf16>, vector<32x128xf32> -> vector<32x128xf32>
    %cst_4 = arith.constant dense<0.000000e+00> : vector<32xf32>
    %4 = vector.multi_reduction <add>, %3, %cst_4 [1] : vector<32x128xf32> to vector<32xf32>
    %5 = vector.shape_cast %4 : vector<32xf32> to vector<32x1xf32>
    %6 = arith.mulf %3, %3 : vector<32x128xf32>
    %cst_5 = arith.constant dense<0.000000e+00> : vector<32xf32>
    %7 = vector.multi_reduction <add>, %6, %cst_5 [1] : vector<32x128xf32> to vector<32xf32>
    %8 = vector.shape_cast %7 : vector<32xf32> to vector<32x1xf32>
    %cst_6 = arith.constant 1.562500e-02 : f32
    %9 = vector.broadcast %cst_6 : f32 to vector<32x1xf32>
    %10 = arith.mulf %5, %9 : vector<32x1xf32>
    %cst_7 = arith.constant 1.562500e-02 : f32
    %11 = vector.broadcast %cst_7 : f32 to vector<32x1xf32>
    %12 = arith.mulf %8, %11 : vector<32x1xf32>
    %13 = arith.mulf %10, %10 : vector<32x1xf32>
    %14 = arith.subf %12, %13 : vector<32x1xf32>
    %cst_8 = arith.constant 0.000000e+00 : f32
    %15 = vector.broadcast %cst_8 : f32 to vector<32x1xf32>
    %16 = arith.maximumf %14, %15 : vector<32x1xf32>
    %17 = vector.broadcast %10 : vector<32x1xf32> to vector<32x128xf32>
    %18 = arith.subf %3, %17 : vector<32x128xf32>
    %cst_9 = arith.constant 9.99999974E-6 : f32
    %19 = vector.broadcast %cst_9 : f32 to vector<32x1xf32>
    %20 = arith.addf %16, %19 : vector<32x1xf32>
    %21 = math.rsqrt %20 : vector<32x1xf32>
    %22 = vector.broadcast %21 : vector<32x1xf32> to vector<32x128xf32>
    %23 = arith.mulf %18, %22 : vector<32x128xf32>
    %cst_10 = arith.constant 0.000000e+00 : f32
    %24 = vector.broadcast %cst_10 : f32 to vector<32x128xf32>
    %25 = arith.maximumf %23, %24 : vector<32x128xf32>
    %c0_11 = arith.constant 0 : index
    %c0_12 = arith.constant 0 : index
    %26 = vector.load %arg4[%c0_11, %c0_12] : memref<128x128xf32, #tpu.memory_space<vmem>>, vector<128x128xf32>
    %cst_13 = arith.constant dense<0.000000e+00> : vector<32x128xf32>
    %27 = tpu.matmul %25, %26, %cst_13 {dimension_numbers = #tpu.dot_dimension_numbers<[1], [0], [0], [1], [0, 0, 1, 1], [], []>} : vector<32x128xf32>, vector<128x128xf32>, vector<32x128xf32> -> vector<32x128xf32>
    %28 = arith.truncf %27 : vector<32x128xf32> to vector<32x128xbf16>
    %c0_14 = arith.constant 0 : index
    %c0_15 = arith.constant 0 : index
    %c0_16 = arith.constant 0 : index
    %29 = vector.load %arg5[%c0_14, %c0_15, %c0_16] : memref<1x32x128xbf16, #tpu.memory_space<vmem>>, vector<1x32x128xbf16>
    %30 = vector.shape_cast %29 : vector<1x32x128xbf16> to vector<32x128xbf16>
    %31 = vector.shape_cast %28 : vector<32x128xbf16> to vector<1x32x128xbf16>
    tpu.vector_store %arg5[%c0_14, %c0_15, %c0_16], %31 {strides = array<i32>} : memref<1x32x128xbf16, #tpu.memory_space<vmem>>, vector<1x32x128xbf16>,
    return
  }
  func.func @transform_0(%arg0: i32) -> (i32, i32, i32) {
    %c0_i32 = arith.constant 0 : i32
    %c0_i32_0 = arith.constant 0 : i32
    %c0_i32_1 = arith.constant 0 : i32
    return %arg0, %c0_i32, %c0_i32_0 : i32, i32, i32
  }
  func.func @transform_1(%arg0: i32) -> (i32, i32) {
    %c0_i32 = arith.constant 0 : i32
    %c0_i32_0 = arith.constant 0 : i32
    %c0_i32_1 = arith.constant 0 : i32
    return %c0_i32, %c0_i32_0 : i32, i32
  }
  func.func @transform_2(%arg0: i32) -> (i32, i32) {
    %c0_i32 = arith.constant 0 : i32
    %c0_i32_0 = arith.constant 0 : i32
    %c0_i32_1 = arith.constant 0 : i32
    return %c0_i32, %c0_i32_0 : i32, i32
  }
  func.func @transform_3(%arg0: i32) -> (i32, i32) {
    %c0_i32 = arith.constant 0 : i32
    %c0_i32_0 = arith.constant 0 : i32
    %c0_i32_1 = arith.constant 0 : i32
    return %c0_i32, %c0_i32_0 : i32, i32
  }
  func.func @transform_4(%arg0: i32) -> (i32, i32, i32) {
    %c0_i32 = arith.constant 0 : i32
    %c0_i32_0 = arith.constant 0 : i32
    %c0_i32_1 = arith.constant 0 : i32
    return %arg0, %c0_i32, %c0_i32_0 : i32, i32, i32
  }
}

module attributes {stable_mosaic.version = 11 : i64} {
  func.func @_conv_kernel(%arg0: i32, %arg1: memref<1x288x128xbf16, #tpu.memory_space<vmem>>, %arg2: memref<32x288xbf16, #tpu.memory_space<vmem>>, %arg3: memref<32x1xf32, #tpu.memory_space<vmem>>, %arg4: memref<1x32x128xbf16, #tpu.memory_space<vmem>>) attributes {dimension_semantics = [#tpu.dimension_semantics<parallel>], iteration_bounds = array<i64: 2>, scalar_prefetch = 0 : i64, scratch_operands = 0 : i64, tpu.core_type = #tpu.core_type<tc>, window_params = [{transform_indices = @transform_0, window_bounds = array<i64: 1, 288, 128>}, {pipeline_mode = #tpu.pipeline_mode<synchronous>, transform_indices = @transform_1, window_bounds = array<i64: 32, 288>}, {pipeline_mode = #tpu.pipeline_mode<synchronous>, transform_indices = @transform_2, window_bounds = array<i64: 32, 1>}, {transform_indices = @transform_3, window_bounds = array<i64: 1, 32, 128>}]} {
    %c0 = arith.constant 0 : index
    %c0_0 = arith.constant 0 : index
    %0 = vector.load %arg2[%c0, %c0_0] : memref<32x288xbf16, #tpu.memory_space<vmem>>, vector<32x288xbf16>
    %c0_1 = arith.constant 0 : index
    %c0_2 = arith.constant 0 : index
    %c0_3 = arith.constant 0 : index
    %1 = vector.load %arg1[%c0_1, %c0_2, %c0_3] : memref<1x288x128xbf16, #tpu.memory_space<vmem>>, vector<1x288x128xbf16>
    %2 = vector.shape_cast %1 : vector<1x288x128xbf16> to vector<288x128xbf16>
    %cst = arith.constant dense<0.000000e+00> : vector<32x128xf32>
    %3 = tpu.matmul %0, %2, %cst {dimension_numbers = #tpu.dot_dimension_numbers<[1], [0], [0], [1], [0, 0, 1, 1], [], []>} : vector<32x288xbf16>, vector<288x128xbf16>, vector<32x128xf32> -> vector<32x128xf32>
    %cst_4 = arith.constant dense<0.000000e+00> : vector<32xf32>
    %4 = vector.multi_reduction <add>, %3, %cst_4 [1] : vector<32x128xf32> to vector<32xf32>
    %5 = vector.shape_cast %4 : vector<32xf32> to vector<32x1xf32>
    %6 = arith.mulf %3, %3 : vector<32x128xf32>
    %cst_5 = arith.constant dense<0.000000e+00> : vector<32xf32>
    %7 = vector.multi_reduction <add>, %6, %cst_5 [1] : vector<32x128xf32> to vector<32xf32>
    %8 = vector.shape_cast %7 : vector<32xf32> to vector<32x1xf32>
    %cst_6 = arith.constant 6.250000e-02 : f32
    %9 = vector.broadcast %cst_6 : f32 to vector<32x1xf32>
    %10 = arith.mulf %5, %9 : vector<32x1xf32>
    %cst_7 = arith.constant 6.250000e-02 : f32
    %11 = vector.broadcast %cst_7 : f32 to vector<32x1xf32>
    %12 = arith.mulf %8, %11 : vector<32x1xf32>
    %13 = arith.mulf %10, %10 : vector<32x1xf32>
    %14 = arith.subf %12, %13 : vector<32x1xf32>
    %cst_8 = arith.constant 0.000000e+00 : f32
    %15 = vector.broadcast %cst_8 : f32 to vector<32x1xf32>
    %16 = arith.maximumf %14, %15 : vector<32x1xf32>
    %17 = vector.broadcast %10 : vector<32x1xf32> to vector<32x128xf32>
    %18 = arith.subf %3, %17 : vector<32x128xf32>
    %cst_9 = arith.constant 9.99999974E-6 : f32
    %19 = vector.broadcast %cst_9 : f32 to vector<32x1xf32>
    %20 = arith.addf %16, %19 : vector<32x1xf32>
    %21 = math.rsqrt %20 : vector<32x1xf32>
    %22 = vector.broadcast %21 : vector<32x1xf32> to vector<32x128xf32>
    %23 = arith.mulf %18, %22 : vector<32x128xf32>
    %cst_10 = arith.constant 0.000000e+00 : f32
    %24 = vector.broadcast %cst_10 : f32 to vector<32x128xf32>
    %25 = arith.maximumf %23, %24 : vector<32x128xf32>
    %26 = arith.truncf %25 : vector<32x128xf32> to vector<32x128xbf16>
    %c0_11 = arith.constant 0 : index
    %c0_12 = arith.constant 0 : index
    %c0_13 = arith.constant 0 : index
    %27 = vector.load %arg4[%c0_11, %c0_12, %c0_13] : memref<1x32x128xbf16, #tpu.memory_space<vmem>>, vector<1x32x128xbf16>
    %28 = vector.shape_cast %27 : vector<1x32x128xbf16> to vector<32x128xbf16>
    %29 = vector.shape_cast %26 : vector<32x128xbf16> to vector<1x32x128xbf16>
    tpu.vector_store %arg4[%c0_11, %c0_12, %c0_13], %29 {strides = array<i32>} : memref<1x32x128xbf16, #tpu.memory_space<vmem>>, vector<1x32x128xbf16>,
    return
  }
  func.func @transform_0(%arg0: i32) -> (i32, i32, i32) {
    %c0_i32 = arith.constant 0 : i32
    %c0_i32_0 = arith.constant 0 : i32
    %c0_i32_1 = arith.constant 0 : i32
    return %arg0, %c0_i32, %c0_i32_0 : i32, i32, i32
  }
  func.func @transform_1(%arg0: i32) -> (i32, i32) {
    %c0_i32 = arith.constant 0 : i32
    %c0_i32_0 = arith.constant 0 : i32
    %c0_i32_1 = arith.constant 0 : i32
    return %c0_i32, %c0_i32_0 : i32, i32
  }
  func.func @transform_2(%arg0: i32) -> (i32, i32) {
    %c0_i32 = arith.constant 0 : i32
    %c0_i32_0 = arith.constant 0 : i32
    %c0_i32_1 = arith.constant 0 : i32
    return %c0_i32, %c0_i32_0 : i32, i32
  }
  func.func @transform_3(%arg0: i32) -> (i32, i32, i32) {
    %c0_i32 = arith.constant 0 : i32
    %c0_i32_0 = arith.constant 0 : i32
    %c0_i32_1 = arith.constant 0 : i32
    return %arg0, %c0_i32, %c0_i32_0 : i32, i32, i32
  }
}

module attributes {stable_mosaic.version = 11 : i64} {
  func.func @_conv_kernel(%arg0: i32, %arg1: memref<1x288x128xbf16, #tpu.memory_space<vmem>>, %arg2: memref<32x288xbf16, #tpu.memory_space<vmem>>, %arg3: memref<32x1xf32, #tpu.memory_space<vmem>>, %arg4: memref<1x32x128xbf16, #tpu.memory_space<vmem>>, %arg5: memref<1x32x128xbf16, #tpu.memory_space<vmem>>) attributes {dimension_semantics = [#tpu.dimension_semantics<parallel>], iteration_bounds = array<i64: 2>, scalar_prefetch = 0 : i64, scratch_operands = 0 : i64, tpu.core_type = #tpu.core_type<tc>, window_params = [{transform_indices = @transform_0, window_bounds = array<i64: 1, 288, 128>}, {pipeline_mode = #tpu.pipeline_mode<synchronous>, transform_indices = @transform_1, window_bounds = array<i64: 32, 288>}, {pipeline_mode = #tpu.pipeline_mode<synchronous>, transform_indices = @transform_2, window_bounds = array<i64: 32, 1>}, {transform_indices = @transform_3, window_bounds = array<i64: 1, 32, 128>}, {transform_indices = @transform_4, window_bounds = array<i64: 1, 32, 128>}]} {
    %c0 = arith.constant 0 : index
    %c0_0 = arith.constant 0 : index
    %0 = vector.load %arg2[%c0, %c0_0] : memref<32x288xbf16, #tpu.memory_space<vmem>>, vector<32x288xbf16>
    %c0_1 = arith.constant 0 : index
    %c0_2 = arith.constant 0 : index
    %c0_3 = arith.constant 0 : index
    %1 = vector.load %arg1[%c0_1, %c0_2, %c0_3] : memref<1x288x128xbf16, #tpu.memory_space<vmem>>, vector<1x288x128xbf16>
    %2 = vector.shape_cast %1 : vector<1x288x128xbf16> to vector<288x128xbf16>
    %cst = arith.constant dense<0.000000e+00> : vector<32x128xf32>
    %3 = tpu.matmul %0, %2, %cst {dimension_numbers = #tpu.dot_dimension_numbers<[1], [0], [0], [1], [0, 0, 1, 1], [], []>} : vector<32x288xbf16>, vector<288x128xbf16>, vector<32x128xf32> -> vector<32x128xf32>
    %cst_4 = arith.constant dense<0.000000e+00> : vector<32xf32>
    %4 = vector.multi_reduction <add>, %3, %cst_4 [1] : vector<32x128xf32> to vector<32xf32>
    %5 = vector.shape_cast %4 : vector<32xf32> to vector<32x1xf32>
    %6 = arith.mulf %3, %3 : vector<32x128xf32>
    %cst_5 = arith.constant dense<0.000000e+00> : vector<32xf32>
    %7 = vector.multi_reduction <add>, %6, %cst_5 [1] : vector<32x128xf32> to vector<32xf32>
    %8 = vector.shape_cast %7 : vector<32xf32> to vector<32x1xf32>
    %cst_6 = arith.constant 6.250000e-02 : f32
    %9 = vector.broadcast %cst_6 : f32 to vector<32x1xf32>
    %10 = arith.mulf %5, %9 : vector<32x1xf32>
    %cst_7 = arith.constant 6.250000e-02 : f32
    %11 = vector.broadcast %cst_7 : f32 to vector<32x1xf32>
    %12 = arith.mulf %8, %11 : vector<32x1xf32>
    %13 = arith.mulf %10, %10 : vector<32x1xf32>
    %14 = arith.subf %12, %13 : vector<32x1xf32>
    %cst_8 = arith.constant 0.000000e+00 : f32
    %15 = vector.broadcast %cst_8 : f32 to vector<32x1xf32>
    %16 = arith.maximumf %14, %15 : vector<32x1xf32>
    %17 = vector.broadcast %10 : vector<32x1xf32> to vector<32x128xf32>
    %18 = arith.subf %3, %17 : vector<32x128xf32>
    %cst_9 = arith.constant 9.99999974E-6 : f32
    %19 = vector.broadcast %cst_9 : f32 to vector<32x1xf32>
    %20 = arith.addf %16, %19 : vector<32x1xf32>
    %21 = math.rsqrt %20 : vector<32x1xf32>
    %22 = vector.broadcast %21 : vector<32x1xf32> to vector<32x128xf32>
    %23 = arith.mulf %18, %22 : vector<32x128xf32>
    %c0_10 = arith.constant 0 : index
    %c0_11 = arith.constant 0 : index
    %c0_12 = arith.constant 0 : index
    %24 = vector.load %arg4[%c0_10, %c0_11, %c0_12] : memref<1x32x128xbf16, #tpu.memory_space<vmem>>, vector<1x32x128xbf16>
    %25 = vector.shape_cast %24 : vector<1x32x128xbf16> to vector<32x128xbf16>
    %26 = arith.extf %25 : vector<32x128xbf16> to vector<32x128xf32>
    %27 = arith.addf %23, %26 : vector<32x128xf32>
    %28 = arith.truncf %27 : vector<32x128xf32> to vector<32x128xbf16>
    %c0_13 = arith.constant 0 : index
    %c0_14 = arith.constant 0 : index
    %c0_15 = arith.constant 0 : index
    %29 = vector.load %arg5[%c0_13, %c0_14, %c0_15] : memref<1x32x128xbf16, #tpu.memory_space<vmem>>, vector<1x32x128xbf16>
    %30 = vector.shape_cast %29 : vector<1x32x128xbf16> to vector<32x128xbf16>
    %31 = vector.shape_cast %28 : vector<32x128xbf16> to vector<1x32x128xbf16>
    tpu.vector_store %arg5[%c0_13, %c0_14, %c0_15], %31 {strides = array<i32>} : memref<1x32x128xbf16, #tpu.memory_space<vmem>>, vector<1x32x128xbf16>,
    return
  }
  func.func @transform_0(%arg0: i32) -> (i32, i32, i32) {
    %c0_i32 = arith.constant 0 : i32
    %c0_i32_0 = arith.constant 0 : i32
    %c0_i32_1 = arith.constant 0 : i32
    return %arg0, %c0_i32, %c0_i32_0 : i32, i32, i32
  }
  func.func @transform_1(%arg0: i32) -> (i32, i32) {
    %c0_i32 = arith.constant 0 : i32
    %c0_i32_0 = arith.constant 0 : i32
    %c0_i32_1 = arith.constant 0 : i32
    return %c0_i32, %c0_i32_0 : i32, i32
  }
  func.func @transform_2(%arg0: i32) -> (i32, i32) {
    %c0_i32 = arith.constant 0 : i32
    %c0_i32_0 = arith.constant 0 : i32
    %c0_i32_1 = arith.constant 0 : i32
    return %c0_i32, %c0_i32_0 : i32, i32
  }
  func.func @transform_3(%arg0: i32) -> (i32, i32, i32) {
    %c0_i32 = arith.constant 0 : i32
    %c0_i32_0 = arith.constant 0 : i32
    %c0_i32_1 = arith.constant 0 : i32
    return %arg0, %c0_i32, %c0_i32_0 : i32, i32, i32
  }
  func.func @transform_4(%arg0: i32) -> (i32, i32, i32) {
    %c0_i32 = arith.constant 0 : i32
    %c0_i32_0 = arith.constant 0 : i32
    %c0_i32_1 = arith.constant 0 : i32
    return %arg0, %c0_i32, %c0_i32_0 : i32, i32, i32
  }
}

module attributes {stable_mosaic.version = 11 : i64} {
  func.func @_conv_kernel(%arg0: i32, %arg1: memref<1x288x128xbf16, #tpu.memory_space<vmem>>, %arg2: memref<16x288xbf16, #tpu.memory_space<vmem>>, %arg3: memref<16x1xf32, #tpu.memory_space<vmem>>, %arg4: memref<1x16x128xbf16, #tpu.memory_space<vmem>>) attributes {dimension_semantics = [#tpu.dimension_semantics<parallel>], iteration_bounds = array<i64: 2>, scalar_prefetch = 0 : i64, scratch_operands = 0 : i64, tpu.core_type = #tpu.core_type<tc>, window_params = [{transform_indices = @transform_0, window_bounds = array<i64: 1, 288, 128>}, {pipeline_mode = #tpu.pipeline_mode<synchronous>, transform_indices = @transform_1, window_bounds = array<i64: 16, 288>}, {pipeline_mode = #tpu.pipeline_mode<synchronous>, transform_indices = @transform_2, window_bounds = array<i64: 16, 1>}, {transform_indices = @transform_3, window_bounds = array<i64: 1, 16, 128>}]} {
    %c0 = arith.constant 0 : index
    %c0_0 = arith.constant 0 : index
    %0 = vector.load %arg2[%c0, %c0_0] : memref<16x288xbf16, #tpu.memory_space<vmem>>, vector<16x288xbf16>
    %c0_1 = arith.constant 0 : index
    %c0_2 = arith.constant 0 : index
    %c0_3 = arith.constant 0 : index
    %1 = vector.load %arg1[%c0_1, %c0_2, %c0_3] : memref<1x288x128xbf16, #tpu.memory_space<vmem>>, vector<1x288x128xbf16>
    %2 = vector.shape_cast %1 : vector<1x288x128xbf16> to vector<288x128xbf16>
    %cst = arith.constant dense<0.000000e+00> : vector<16x128xf32>
    %3 = tpu.matmul %0, %2, %cst {dimension_numbers = #tpu.dot_dimension_numbers<[1], [0], [0], [1], [0, 0, 1, 1], [], []>} : vector<16x288xbf16>, vector<288x128xbf16>, vector<16x128xf32> -> vector<16x128xf32>
    %cst_4 = arith.constant dense<0.000000e+00> : vector<16xf32>
    %4 = vector.multi_reduction <add>, %3, %cst_4 [1] : vector<16x128xf32> to vector<16xf32>
    %5 = vector.shape_cast %4 : vector<16xf32> to vector<16x1xf32>
    %6 = arith.mulf %3, %3 : vector<16x128xf32>
    %cst_5 = arith.constant dense<0.000000e+00> : vector<16xf32>
    %7 = vector.multi_reduction <add>, %6, %cst_5 [1] : vector<16x128xf32> to vector<16xf32>
    %8 = vector.shape_cast %7 : vector<16xf32> to vector<16x1xf32>
    %cst_6 = arith.constant 1.562500e-02 : f32
    %9 = vector.broadcast %cst_6 : f32 to vector<16x1xf32>
    %10 = arith.mulf %5, %9 : vector<16x1xf32>
    %cst_7 = arith.constant 1.562500e-02 : f32
    %11 = vector.broadcast %cst_7 : f32 to vector<16x1xf32>
    %12 = arith.mulf %8, %11 : vector<16x1xf32>
    %13 = arith.mulf %10, %10 : vector<16x1xf32>
    %14 = arith.subf %12, %13 : vector<16x1xf32>
    %cst_8 = arith.constant 0.000000e+00 : f32
    %15 = vector.broadcast %cst_8 : f32 to vector<16x1xf32>
    %16 = arith.maximumf %14, %15 : vector<16x1xf32>
    %17 = vector.broadcast %10 : vector<16x1xf32> to vector<16x128xf32>
    %18 = arith.subf %3, %17 : vector<16x128xf32>
    %cst_9 = arith.constant 9.99999974E-6 : f32
    %19 = vector.broadcast %cst_9 : f32 to vector<16x1xf32>
    %20 = arith.addf %16, %19 : vector<16x1xf32>
    %21 = math.rsqrt %20 : vector<16x1xf32>
    %22 = vector.broadcast %21 : vector<16x1xf32> to vector<16x128xf32>
    %23 = arith.mulf %18, %22 : vector<16x128xf32>
    %cst_10 = arith.constant 0.000000e+00 : f32
    %24 = vector.broadcast %cst_10 : f32 to vector<16x128xf32>
    %25 = arith.maximumf %23, %24 : vector<16x128xf32>
    %26 = arith.truncf %25 : vector<16x128xf32> to vector<16x128xbf16>
    %c0_11 = arith.constant 0 : index
    %c0_12 = arith.constant 0 : index
    %c0_13 = arith.constant 0 : index
    %27 = vector.load %arg4[%c0_11, %c0_12, %c0_13] : memref<1x16x128xbf16, #tpu.memory_space<vmem>>, vector<1x16x128xbf16>
    %28 = vector.shape_cast %27 : vector<1x16x128xbf16> to vector<16x128xbf16>
    %29 = vector.shape_cast %26 : vector<16x128xbf16> to vector<1x16x128xbf16>
    tpu.vector_store %arg4[%c0_11, %c0_12, %c0_13], %29 {strides = array<i32>} : memref<1x16x128xbf16, #tpu.memory_space<vmem>>, vector<1x16x128xbf16>,
    return
  }
  func.func @transform_0(%arg0: i32) -> (i32, i32, i32) {
    %c0_i32 = arith.constant 0 : i32
    %c0_i32_0 = arith.constant 0 : i32
    %c0_i32_1 = arith.constant 0 : i32
    return %arg0, %c0_i32, %c0_i32_0 : i32, i32, i32
  }
  func.func @transform_1(%arg0: i32) -> (i32, i32) {
    %c0_i32 = arith.constant 0 : i32
    %c0_i32_0 = arith.constant 0 : i32
    %c0_i32_1 = arith.constant 0 : i32
    return %c0_i32, %c0_i32_0 : i32, i32
  }
  func.func @transform_2(%arg0: i32) -> (i32, i32) {
    %c0_i32 = arith.constant 0 : i32
    %c0_i32_0 = arith.constant 0 : i32
    %c0_i32_1 = arith.constant 0 : i32
    return %c0_i32, %c0_i32_0 : i32, i32
  }
  func.func @transform_3(%arg0: i32) -> (i32, i32, i32) {
    %c0_i32 = arith.constant 0 : i32
    %c0_i32_0 = arith.constant 0 : i32
    %c0_i32_1 = arith.constant 0 : i32
    return %arg0, %c0_i32, %c0_i32_0 : i32, i32, i32
  }
}

module attributes {stable_mosaic.version = 11 : i64} {
  func.func @_conv_kernel(%arg0: i32, %arg1: memref<1x144x256xbf16, #tpu.memory_space<vmem>>, %arg2: memref<8x144xbf16, #tpu.memory_space<vmem>>, %arg3: memref<8x1xf32, #tpu.memory_space<vmem>>, %arg4: memref<1x8x256xbf16, #tpu.memory_space<vmem>>) attributes {dimension_semantics = [#tpu.dimension_semantics<parallel>], iteration_bounds = array<i64: 2>, scalar_prefetch = 0 : i64, scratch_operands = 0 : i64, tpu.core_type = #tpu.core_type<tc>, window_params = [{transform_indices = @transform_0, window_bounds = array<i64: 1, 144, 256>}, {pipeline_mode = #tpu.pipeline_mode<synchronous>, transform_indices = @transform_1, window_bounds = array<i64: 8, 144>}, {pipeline_mode = #tpu.pipeline_mode<synchronous>, transform_indices = @transform_2, window_bounds = array<i64: 8, 1>}, {transform_indices = @transform_3, window_bounds = array<i64: 1, 8, 256>}]} {
    %c0 = arith.constant 0 : index
    %c0_0 = arith.constant 0 : index
    %0 = vector.load %arg2[%c0, %c0_0] : memref<8x144xbf16, #tpu.memory_space<vmem>>, vector<8x144xbf16>
    %c0_1 = arith.constant 0 : index
    %c0_2 = arith.constant 0 : index
    %c0_3 = arith.constant 0 : index
    %1 = vector.load %arg1[%c0_1, %c0_2, %c0_3] : memref<1x144x256xbf16, #tpu.memory_space<vmem>>, vector<1x144x256xbf16>
    %2 = vector.shape_cast %1 : vector<1x144x256xbf16> to vector<144x256xbf16>
    %cst = arith.constant dense<0.000000e+00> : vector<8x256xf32>
    %3 = tpu.matmul %0, %2, %cst {dimension_numbers = #tpu.dot_dimension_numbers<[1], [0], [0], [1], [0, 0, 1, 1], [], []>} : vector<8x144xbf16>, vector<144x256xbf16>, vector<8x256xf32> -> vector<8x256xf32>
    %cst_4 = arith.constant dense<0.000000e+00> : vector<8xf32>
    %4 = vector.multi_reduction <add>, %3, %cst_4 [1] : vector<8x256xf32> to vector<8xf32>
    %5 = vector.shape_cast %4 : vector<8xf32> to vector<8x1xf32>
    %6 = arith.mulf %3, %3 : vector<8x256xf32>
    %cst_5 = arith.constant dense<0.000000e+00> : vector<8xf32>
    %7 = vector.multi_reduction <add>, %6, %cst_5 [1] : vector<8x256xf32> to vector<8xf32>
    %8 = vector.shape_cast %7 : vector<8xf32> to vector<8x1xf32>
    %cst_6 = arith.constant 3.906250e-03 : f32
    %9 = vector.broadcast %cst_6 : f32 to vector<8x1xf32>
    %10 = arith.mulf %5, %9 : vector<8x1xf32>
    %cst_7 = arith.constant 3.906250e-03 : f32
    %11 = vector.broadcast %cst_7 : f32 to vector<8x1xf32>
    %12 = arith.mulf %8, %11 : vector<8x1xf32>
    %13 = arith.mulf %10, %10 : vector<8x1xf32>
    %14 = arith.subf %12, %13 : vector<8x1xf32>
    %cst_8 = arith.constant 0.000000e+00 : f32
    %15 = vector.broadcast %cst_8 : f32 to vector<8x1xf32>
    %16 = arith.maximumf %14, %15 : vector<8x1xf32>
    %17 = vector.broadcast %10 : vector<8x1xf32> to vector<8x256xf32>
    %18 = arith.subf %3, %17 : vector<8x256xf32>
    %cst_9 = arith.constant 9.99999974E-6 : f32
    %19 = vector.broadcast %cst_9 : f32 to vector<8x1xf32>
    %20 = arith.addf %16, %19 : vector<8x1xf32>
    %21 = math.rsqrt %20 : vector<8x1xf32>
    %22 = vector.broadcast %21 : vector<8x1xf32> to vector<8x256xf32>
    %23 = arith.mulf %18, %22 : vector<8x256xf32>
    %cst_10 = arith.constant 0.000000e+00 : f32
    %24 = vector.broadcast %cst_10 : f32 to vector<8x256xf32>
    %25 = arith.maximumf %23, %24 : vector<8x256xf32>
    %26 = arith.truncf %25 : vector<8x256xf32> to vector<8x256xbf16>
    %c0_11 = arith.constant 0 : index
    %c0_12 = arith.constant 0 : index
    %c0_13 = arith.constant 0 : index
    %27 = vector.load %arg4[%c0_11, %c0_12, %c0_13] : memref<1x8x256xbf16, #tpu.memory_space<vmem>>, vector<1x8x256xbf16>
    %28 = vector.shape_cast %27 : vector<1x8x256xbf16> to vector<8x256xbf16>
    %29 = vector.shape_cast %26 : vector<8x256xbf16> to vector<1x8x256xbf16>
    tpu.vector_store %arg4[%c0_11, %c0_12, %c0_13], %29 {strides = array<i32>} : memref<1x8x256xbf16, #tpu.memory_space<vmem>>, vector<1x8x256xbf16>,
    return
  }
  func.func @transform_0(%arg0: i32) -> (i32, i32, i32) {
    %c0_i32 = arith.constant 0 : i32
    %c0_i32_0 = arith.constant 0 : i32
    %c0_i32_1 = arith.constant 0 : i32
    return %arg0, %c0_i32, %c0_i32_0 : i32, i32, i32
  }
  func.func @transform_1(%arg0: i32) -> (i32, i32) {
    %c0_i32 = arith.constant 0 : i32
    %c0_i32_0 = arith.constant 0 : i32
    %c0_i32_1 = arith.constant 0 : i32
    return %c0_i32, %c0_i32_0 : i32, i32
  }
  func.func @transform_2(%arg0: i32) -> (i32, i32) {
    %c0_i32 = arith.constant 0 : i32
    %c0_i32_0 = arith.constant 0 : i32
    %c0_i32_1 = arith.constant 0 : i32
    return %c0_i32, %c0_i32_0 : i32, i32
  }
  func.func @transform_3(%arg0: i32) -> (i32, i32, i32) {
    %c0_i32 = arith.constant 0 : i32
    %c0_i32_0 = arith.constant 0 : i32
    %c0_i32_1 = arith.constant 0 : i32
    return %arg0, %c0_i32, %c0_i32_0 : i32, i32, i32
  }
}

module attributes {stable_mosaic.version = 11 : i64} {
  func.func @_conv_kernel(%arg0: i32, %arg1: memref<1x400x256xbf16, #tpu.memory_space<vmem>>, %arg2: memref<8x400xbf16, #tpu.memory_space<vmem>>, %arg3: memref<8x1xf32, #tpu.memory_space<vmem>>, %arg4: memref<1x8x256xf32, #tpu.memory_space<vmem>>) attributes {dimension_semantics = [#tpu.dimension_semantics<parallel>], iteration_bounds = array<i64: 2>, scalar_prefetch = 0 : i64, scratch_operands = 0 : i64, tpu.core_type = #tpu.core_type<tc>, window_params = [{transform_indices = @transform_0, window_bounds = array<i64: 1, 400, 256>}, {pipeline_mode = #tpu.pipeline_mode<synchronous>, transform_indices = @transform_1, window_bounds = array<i64: 8, 400>}, {pipeline_mode = #tpu.pipeline_mode<synchronous>, transform_indices = @transform_2, window_bounds = array<i64: 8, 1>}, {transform_indices = @transform_3, window_bounds = array<i64: 1, 8, 256>}]} {
    %c0 = arith.constant 0 : index
    %c0_0 = arith.constant 0 : index
    %0 = vector.load %arg2[%c0, %c0_0] : memref<8x400xbf16, #tpu.memory_space<vmem>>, vector<8x400xbf16>
    %c0_1 = arith.constant 0 : index
    %c0_2 = arith.constant 0 : index
    %c0_3 = arith.constant 0 : index
    %1 = vector.load %arg1[%c0_1, %c0_2, %c0_3] : memref<1x400x256xbf16, #tpu.memory_space<vmem>>, vector<1x400x256xbf16>
    %2 = vector.shape_cast %1 : vector<1x400x256xbf16> to vector<400x256xbf16>
    %cst = arith.constant dense<0.000000e+00> : vector<8x256xf32>
    %3 = tpu.matmul %0, %2, %cst {dimension_numbers = #tpu.dot_dimension_numbers<[1], [0], [0], [1], [0, 0, 1, 1], [], []>} : vector<8x400xbf16>, vector<400x256xbf16>, vector<8x256xf32> -> vector<8x256xf32>
    %c0_4 = arith.constant 0 : index
    %c0_5 = arith.constant 0 : index
    %4 = vector.load %arg3[%c0_4, %c0_5] : memref<8x1xf32, #tpu.memory_space<vmem>>, vector<8x1xf32>
    %5 = vector.broadcast %4 : vector<8x1xf32> to vector<8x256xf32>
    %6 = arith.addf %3, %5 : vector<8x256xf32>
    %7 = math.tanh %6 : vector<8x256xf32>
    %c0_6 = arith.constant 0 : index
    %c0_7 = arith.constant 0 : index
    %c0_8 = arith.constant 0 : index
    %8 = vector.load %arg4[%c0_6, %c0_7, %c0_8] : memref<1x8x256xf32, #tpu.memory_space<vmem>>, vector<1x8x256xf32>
    %9 = vector.shape_cast %8 : vector<1x8x256xf32> to vector<8x256xf32>
    %10 = vector.shape_cast %7 : vector<8x256xf32> to vector<1x8x256xf32>
    tpu.vector_store %arg4[%c0_6, %c0_7, %c0_8], %10 {strides = array<i32>} : memref<1x8x256xf32, #tpu.memory_space<vmem>>, vector<1x8x256xf32>,
    return
  }
  func.func @transform_0(%arg0: i32) -> (i32, i32, i32) {
    %c0_i32 = arith.constant 0 : i32
    %c0_i32_0 = arith.constant 0 : i32
    %c0_i32_1 = arith.constant 0 : i32
    return %arg0, %c0_i32, %c0_i32_0 : i32, i32, i32
  }
  func.func @transform_1(%arg0: i32) -> (i32, i32) {
    %c0_i32 = arith.constant 0 : i32
    %c0_i32_0 = arith.constant 0 : i32
    %c0_i32_1 = arith.constant 0 : i32
    return %c0_i32, %c0_i32_0 : i32, i32
  }
  func.func @transform_2(%arg0: i32) -> (i32, i32) {
    %c0_i32 = arith.constant 0 : i32
    %c0_i32_0 = arith.constant 0 : i32
    %c0_i32_1 = arith.constant 0 : i32
    return %c0_i32, %c0_i32_0 : i32, i32
  }
  func.func @transform_3(%arg0: i32) -> (i32, i32, i32) {
    %c0_i32 = arith.constant 0 : i32
    %c0_i32_0 = arith.constant 0 : i32
    %c0_i32_1 = arith.constant 0 : i32
    return %arg0, %c0_i32, %c0_i32_0 : i32, i32, i32
  }
}

</mosaic_0001>

<bundles_post_ra>
// kernel: generator_forward.10
= control target key start
LH: loop header
LB: loop body
LE: loop exit
PB: predicated region body
PF: predicated region fallthrough
CT: control target
= control target key end

     0   :  { %s536_s12 = smov 0   ;;  %s582_s0 = inlined_call_operand.vmem [shape: bf16[2,160,256], index: 0, kind: input, shape index: {}]   ;;  %s583_s1 = inlined_call_operand.vmem [shape: bf16[8,160], index: 1, kind: input, shape index: {}]   ;;  %s584_s2 = inlined_call_operand.vmem [shape: f32[8,1], index: 2, kind: input, shape index: {}]   ;;  %s585_s3 = inlined_call_operand.vmem [shape: bf16[2,8,256], index: 3, kind: output, shape index: {}]  }
   0x1 LB: > { %s429_s13 = sadd.s32 4294967295, %s514_s12   ;;  %p433_p0 = scmp.ge.s32.totalorder %s514_s12, 1  ;;  %s514_s12 = sphi %s536_s12, %s13_s12  }
   0x2   : > { %p137_p1 = scmp.lt.s32.totalorder %s514_s12, 3 }
   0x4   : > { %p138_p2 = pnand %p433_p0, %p137_p1 }
   0x5   : > { %p161_p3 = scmp.lt.s32.totalorder (!%p138_p2), %s429_s13, 1 }
   0x6   : > { %141 = sbr.rel (%p138_p2) target bundleno = 424 (0x1a8), region = 32 }
   0xb   : > { %v172_v0 = vld [vmem:[%s583_s1] sm:$0xff]  ;;  %vm299_vm0 = vcmask 261120   ;;  %s587_s13 = smov (!%p161_p3, %s429_s13), 1 }
   0xc   : > { %v438_v1 = vcombine.high %v172_v0, %v172_v0  ;;  %s465_s15 = smul.u32 160, %s587_s13  ;;  %v437_v22 = vcombine.low %v172_v0, %v172_v0  ;;  %s463_s19 = sshll.u32 %s587_s13, 3 }
   0xd   : > { %s170_s22 = scalar_lea.vmem %s585_s3, %s463_s19 }
   0xe   : > { %459 = vmatprep.mubr.msk.bf16.mxu0 %vm299_vm0, %v438_v1  ;;  %s553_s18 = scalar_lea.vmem %s582_s0, %s465_s15 }
   0xf   : > { %v474_v2 = vld [vmem:[%s553_s18 + $0x74] ss:$8 sps:$4 sm:$0xff]   ;;  %v476_v3 = vld [vmem:[%s553_s18 + $0x70] ss:$8 sps:$4 sm:$0xff]   ;;  %v477_v4 = vld [vmem:[%s553_s18 + $0x64] ss:$8 sps:$4 sm:$0xff]  }
  0x10   : > { %303 = vmatprep.subr.bf16.mxu0 %v474_v2  ;;  %v479_v5 = vld [vmem:[%s553_s18 + $0x60] ss:$8 sps:$4 sm:$0xff]   ;;  %v480_v6 = vld [vmem:[%s553_s18 + $0x54] ss:$8 sps:$4 sm:$0xff]   ;;  %v482_v7 = vld [vmem:[%s553_s18 + $0x50] ss:$8 sps:$4 sm:$0xff]  }
  0x11   : > { %304 = vmatpush1.bf16.msra.mxu0 %v476_v3  ;;  %v483_v8 = vld [vmem:[%s553_s18 + $0x44] ss:$8 sps:$4 sm:$0xff]   ;;  %v485_v9 = vld [vmem:[%s553_s18 + $0x40] ss:$8 sps:$4 sm:$0xff]   ;;  %v486_v10 = vld [vmem:[%s553_s18 + $0x34] ss:$8 sps:$4 sm:$0xff]  }
  0x12   : > { %305 = vmatprep.subr.bf16.mxu0 %v477_v4  ;;  %v488_v11 = vld [vmem:[%s553_s18 + $0x30] ss:$8 sps:$4 sm:$0xff]   ;;  %v489_v12 = vld [vmem:[%s553_s18 + $0x24] ss:$8 sps:$4 sm:$0xff]   ;;  %v491_v13 = vld [vmem:[%s553_s18 + $0x20] ss:$8 sps:$4 sm:$0xff]  }
  0x13   : > { %v492_v14 = vld [vmem:[%s553_s18 + $0x14] ss:$8 sps:$4 sm:$0xff]   ;;  %v494_v15 = vld [vmem:[%s553_s18 + $0x10] ss:$8 sps:$4 sm:$0xff]   ;;  %v495_v16 = vld [vmem:[%s553_s18 + $0x4] ss:$8 sps:$4 sm:$0xff]  }
  0x14   : > { %v497_v17 = vld [vmem:[%s553_s18] ss:$8 sps:$4 sm:$0xff]   ;;  %v498_v18 = vld [vmem:[%s553_s18 + $0x94] ss:$8 sps:$4 sm:$0xff]   ;;  %v500_v19 = vld [vmem:[%s553_s18 + $0x90] ss:$8 sps:$4 sm:$0xff]  }
  0x15   : > { %306 = vmatpush1.bf16.msra.mxu0 %v479_v5  ;;  %v501_v20 = vld [vmem:[%s553_s18 + $0x84] ss:$8 sps:$4 sm:$0xff]   ;;  %v503_v21 = vld [vmem:[%s553_s18 + $0x80] ss:$8 sps:$4 sm:$0xff]  }
  0x16   : > { %307 = vmatprep.subr.bf16.mxu0 %v480_v6 }
  0x19   : > { %308 = vmatpush1.bf16.msra.mxu0 %v482_v7 }
  0x1a   : > { %309 = vmatprep.subr.bf16.mxu0 %v483_v8 }
  0x1d   : > { %310 = vmatpush1.bf16.msra.mxu0 %v485_v9 }
  0x1e   : > { %311 = vmatprep.subr.bf16.mxu0 %v486_v10 }
  0x21   : > { %312 = vmatpush1.bf16.msra.mxu0 %v488_v11 }
  0x22   : > { %313 = vmatprep.subr.bf16.mxu0 %v489_v12 }
  0x25   : > { %314 = vmatpush1.bf16.msra.mxu0 %v491_v13 }
  0x26   : > { %315 = vmatprep.subr.bf16.mxu0 %v492_v14 }
  0x29   : > { %316 = vmatpush1.bf16.msra.mxu0 %v494_v15 }
  0x2a   : > { %317 = vmatprep.subr.bf16.mxu0 %v495_v16 }
  0x2d   : > { %318 = vmatpush1.bf16.msra.mxu0 %v497_v17 }
  0x2e   : > { %331 = vmatprep.subr.bf16.mxu0 %v498_v18 }
  0x31   : > { %332 = vmatpush2.bf16.msra.mxu0 %v500_v19 }
  0x32   : > { %333 = vmatprep.subr.bf16.mxu0 %v501_v20 }
  0x35   : > { %334 = vmatpush2.bf16.msra.mxu0 %v503_v21 }
  0x38   : > { %336 = vmatmul.mubr.bf16.vlgmr.msra.gmra.mxu0 %v437_v22 }
  0xf8   : > { %v337_v23 = vpop.f32.mrf.mxu0 }
  0xf9   : > { %v347_v28 = vmul.f32 %v337_v23, %v337_v23 }
  0xfa   : > { %v339_v24 = vpop.f32.mrf.mxu0 }
  0xfb   : > { %v344_v25 = vadd.f32 %v339_v24, %v337_v23  ;;  %v348_v26 = vmul.f32 %v339_v24, %v339_v24 }
  0xfc   : > { %v341_v27 = vpop.f32.mrf.mxu0 }
  0xfd   : > { %345 = vadd.xlane.f32.xlu0 %v344_v25  ;;  %v349_v30 = vadd.f32 %v348_v26, %v347_v28 }
  0xfe   : > { %v342_v29 = vpop.f32.mrf.mxu0 }
 0x101   : > { %350 = vadd.xlane.f32.xlu0 %v349_v30 }
 0x186   : > { %v346_v31 = vpop.xlane.xlu0 %345 }
 0x187   : > { %v352_v32 = vmul.f32 0.00390625, %v346_v31 }
 0x189   : > { %v354_v34 = vmul.f32 %v352_v32, %v352_v32  ;;  %v357_v39 = vsub.f32 %v337_v23, %v352_v32  ;;  %v358_v40 = vsub.f32 %v339_v24, %v352_v32 }
 0x18a   : > { %v351_v33 = vpop.xlane.xlu0 %350 }
 0x18b   : > { %v353_v35 = vmul.f32 0.00390625, %v351_v33 }
 0x18d   : > { %v355_v36 = vsub.f32 %v353_v35, %v354_v34 }
 0x18f   : > { %v356_v37 = vmax.f32 %v355_v36, 0.0 }
 0x191   : > { %v359_v38 = vadd.f32 1e-05, %v356_v37 }
 0x193   : > { %506 = vrsqrt.f32 %v359_v38 }
 0x1a0   : > { %v507_v41 = vpop.eup %506 }
 0x1a1   : > { %v361_v42 = vmul.f32 %v507_v41, %v357_v39  ;;  %v362_v43 = vmul.f32 %v507_v41, %v358_v40 }
 0x1a3   : > { %v363_v44 = vmax.f32 %v361_v42, 0.0  ;;  %v364_v45 = vmax.f32 %v362_v43, 0.0 }
 0x1a5   : > { %v464_v46 = vpack.c.bf16 %v364_v45, %v363_v44 }
 0x1a7   : > { %373 = vst [vmem:[%s170_s22] sm:$0xff] %v464_v46 }
 0x1a8 PF: > { %s13_s12 = sadd.s32 1, %s514_s12  }
 0x1a9   : > { %p10_p4 = scmp.ge.s32.totalorder %s13_s12, 4  }
 0x1ab   :  { %12 = sbr.rel (!%p10_p4) target bundleno = 1 (0x1), region = 62 }

// kernel: generator_forward.11
= control target key start
LH: loop header
LB: loop body
LE: loop exit
PB: predicated region body
PF: predicated region fallthrough
CT: control target
= control target key end

     0   :  { %s661_s15 = smov 0   ;;  %s805_s0 = inlined_call_operand.vmem [shape: bf16[2,80,256], index: 0, kind: input, shape index: {}]   ;;  %s806_s1 = inlined_call_operand.vmem [shape: bf16[16,80], index: 1, kind: input, shape index: {}]   ;;  %s807_s2 = inlined_call_operand.vmem [shape: f32[16,1], index: 2, kind: input, shape index: {}]   ;;  %s808_s3 = inlined_call_operand.vmem [shape: f32[256,128], index: 3, kind: input, shape index: {}]   ;;  %s809_s4 = inlined_call_operand.vmem [shape: bf16[2,16,128], index: 4, kind: output, shape index: {}]  }
   0x1 LB: > { %s527_s16 = sadd.s32 4294967295, %s633_s15   ;;  %p531_p0 = scmp.ge.s32.totalorder %s633_s15, 1  ;;  %s633_s15 = sphi %s661_s15, %s14_s15  }
   0x2   : > { %p162_p1 = scmp.lt.s32.totalorder %s633_s15, 3 }
   0x4   : > { %p163_p2 = pnand %p531_p0, %p162_p1 }
   0x5   : > { %p188_p3 = scmp.lt.s32.totalorder (!%p163_p2), %s527_s16, 1 }
   0x6   : > { %166 = sbr.rel (%p163_p2) target bundleno = 606 (0x25e), region = 36 }
   0xb   : > { %v635_v0 = vmov 0   ;;  %s811_s16 = smov (!%p188_p3, %s527_s16), 1  ;;  %v622_v11 = vld [vmem:[%s806_s1] sm:$0xff]   ;;  %vm266_vm0 = vcmask 654336   ;;  %v386_v12 = vld [vmem:[%s808_s3 + $0xf8] sm:$0xff]  ;;  %v385_v26 = vld [vmem:[%s808_s3 + $0xf0] sm:$0xff] }
   0xc   : > { %302 = vmatprep.mubr.bf16.mxu0 %v635_v0  ;;  %s597_s2 = smul.u32 80, %s811_s16  ;;  %559 = vmatprep.subr.mxu1 %v386_v12  ;;  %v370_v25 = vld [vmem:[%s808_s3 + $0x78] sm:$0xff]  ;;  %v369_v27 = vld [vmem:[%s808_s3 + $0x70] sm:$0xff]  ;;  %v384_v28 = vld [vmem:[%s808_s3 + $0xe8] sm:$0xff]  ;;  %s551_s10 = sshll.u32 %s811_s16, 3 }
   0xd   : > { %560 = vmatpush3.msra.mxu1 %v370_v25  ;;  %v368_v29 = vld [vmem:[%s808_s3 + $0x68] sm:$0xff]  ;;  %v383_v30 = vld [vmem:[%s808_s3 + $0xe0] sm:$0xff]  ;;  %v382_v32 = vld [vmem:[%s808_s3 + $0xd8] sm:$0xff]  ;;  %s197_s13 = scalar_lea.vmem %s809_s4, %s551_s10 }
   0xe   : > { %s192_s19 = scalar_lea.vmem %s805_s0, %s597_s2  ;;  %561 = vmatprep.subr.mxu1 %v385_v26  ;;  %v367_v31 = vld [vmem:[%s808_s3 + $0x60] sm:$0xff]  ;;  %v366_v33 = vld [vmem:[%s808_s3 + $0x58] sm:$0xff]  ;;  %v381_v34 = vld [vmem:[%s808_s3 + $0xd0] sm:$0xff] }
   0xf   : > { %v607_v1 = vld [vmem:[%s192_s19 + $0x44] ss:$8 sps:$4 sm:$0xff]   ;;  %v609_v2 = vld [vmem:[%s192_s19 + $0x40] ss:$8 sps:$4 sm:$0xff]   ;;  %v610_v3 = vld [vmem:[%s192_s19 + $0x34] ss:$8 sps:$4 sm:$0xff]   ;;  %562 = vmatpush3.msra.mxu1 %v369_v27 }
  0x10   : > { %276 = vmatprep.subr.bf16.mxu0 %v607_v1  ;;  %v612_v4 = vld [vmem:[%s192_s19 + $0x30] ss:$8 sps:$4 sm:$0xff]   ;;  %v613_v5 = vld [vmem:[%s192_s19 + $0x24] ss:$8 sps:$4 sm:$0xff]   ;;  %v615_v6 = vld [vmem:[%s192_s19 + $0x20] ss:$8 sps:$4 sm:$0xff]   ;;  %563 = vmatprep.subr.mxu1 %v384_v28 }
  0x11   : > { %277 = vmatpush1.bf16.msra.mxu0 %v609_v2  ;;  %v616_v7 = vld [vmem:[%s192_s19 + $0x14] ss:$8 sps:$4 sm:$0xff]   ;;  %v618_v8 = vld [vmem:[%s192_s19 + $0x10] ss:$8 sps:$4 sm:$0xff]   ;;  %v619_v9 = vld [vmem:[%s192_s19 + $0x4] ss:$8 sps:$4 sm:$0xff]   ;;  %564 = vmatpush3.msra.mxu1 %v368_v29 }
  0x12   : > { %278 = vmatprep.subr.bf16.mxu0 %v610_v3  ;;  %v621_v10 = vld [vmem:[%s192_s19] ss:$8 sps:$4 sm:$0xff]   ;;  %565 = vmatprep.subr.mxu1 %v383_v30  ;;  %v365_v35 = vld [vmem:[%s808_s3 + $0x50] sm:$0xff]  ;;  %v378_v40 = vld [vmem:[%s808_s3 + $0xb8] sm:$0xff] }
  0x13   : > { %566 = vmatpush3.msra.mxu1 %v367_v31  ;;  %v380_v36 = vld [vmem:[%s808_s3 + $0xc8] sm:$0xff]  ;;  %v379_v38 = vld [vmem:[%s808_s3 + $0xc0] sm:$0xff]  ;;  %v362_v41 = vld [vmem:[%s808_s3 + $0x38] sm:$0xff] }
  0x14   : > { %567 = vmatprep.subr.mxu1 %v382_v32  ;;  %v364_v37 = vld [vmem:[%s808_s3 + $0x48] sm:$0xff]  ;;  %v363_v39 = vld [vmem:[%s808_s3 + $0x40] sm:$0xff]  ;;  %v377_v42 = vld [vmem:[%s808_s3 + $0xb0] sm:$0xff] }
  0x15   : > { %279 = vmatpush1.bf16.msra.mxu0 %v612_v4  ;;  %568 = vmatpush3.msra.mxu1 %v366_v33  ;;  %v361_v43 = vld [vmem:[%s808_s3 + $0x30] sm:$0xff]  ;;  %v376_v44 = vld [vmem:[%s808_s3 + $0xa8] sm:$0xff]  ;;  %v375_v46 = vld [vmem:[%s808_s3 + $0xa0] sm:$0xff] }
  0x16   : > { %280 = vmatprep.subr.bf16.mxu0 %v613_v5  ;;  %569 = vmatprep.subr.mxu1 %v381_v34  ;;  %v360_v45 = vld [vmem:[%s808_s3 + $0x28] sm:$0xff]  ;;  %v359_v47 = vld [vmem:[%s808_s3 + $0x20] sm:$0xff]  ;;  %v374_v48 = vld [vmem:[%s808_s3 + $0x98] sm:$0xff] }
  0x17   : > { %570 = vmatpush3.msra.mxu1 %v365_v35  ;;  %v358_v49 = vld [vmem:[%s808_s3 + $0x18] sm:$0xff]  ;;  %v373_v50 = vld [vmem:[%s808_s3 + $0x90] sm:$0xff]  ;;  %v372_v52 = vld [vmem:[%s808_s3 + $0x88] sm:$0xff] }
  0x18   : > { %571 = vmatprep.subr.mxu1 %v380_v36  ;;  %v357_v51 = vld [vmem:[%s808_s3 + $0x10] sm:$0xff]  ;;  %v356_v53 = vld [vmem:[%s808_s3 + $0x8] sm:$0xff]  ;;  %v371_v54 = vld [vmem:[%s808_s3 + $0x80] sm:$0xff] }
  0x19   : > { %281 = vmatpush1.bf16.msra.mxu0 %v615_v6  ;;  %572 = vmatpush3.msra.mxu1 %v364_v37  ;;  %v355_v55 = vld [vmem:[%s808_s3] sm:$0xff] }
  0x1a   : > { %282 = vmatprep.subr.bf16.mxu0 %v616_v7  ;;  %573 = vmatprep.subr.mxu1 %v379_v38 }
  0x1b   : > { %574 = vmatpush3.msra.mxu1 %v363_v39 }
  0x1c   : > { %575 = vmatprep.subr.mxu1 %v378_v40 }
  0x1d   : > { %283 = vmatpush1.bf16.msra.mxu0 %v618_v8  ;;  %576 = vmatpush3.msra.mxu1 %v362_v41 }
  0x1e   : > { %284 = vmatprep.subr.bf16.mxu0 %v619_v9  ;;  %577 = vmatprep.subr.mxu1 %v377_v42 }
  0x1f   : > { %578 = vmatpush3.msra.mxu1 %v361_v43 }
  0x20   : > { %579 = vmatprep.subr.mxu1 %v376_v44 }
  0x21   : > { %285 = vmatpush1.bf16.msra.mxu0 %v621_v10  ;;  %580 = vmatpush3.msra.mxu1 %v360_v45 }
  0x22   : > { %581 = vmatprep.subr.mxu1 %v375_v46 }
  0x23   : > { %582 = vmatpush3.msra.mxu1 %v359_v47 }
  0x24   : > { %546 = vmatmul.mubr.msk.bf16.vlgmr.msra.gmra.mxu0 %vm266_vm0, %v622_v11  ;;  %583 = vmatprep.subr.mxu1 %v374_v48 }
  0x25   : > { %584 = vmatpush3.msra.mxu1 %v358_v49 }
  0x26   : > { %585 = vmatprep.subr.mxu1 %v373_v50 }
  0x27   : > { %586 = vmatpush3.msra.mxu1 %v357_v51 }
  0x28   : > { %587 = vmatprep.subr.mxu1 %v372_v52 }
  0x29   : > { %588 = vmatpush3.msra.mxu1 %v356_v53 }
  0x2a   : > { %589 = vmatprep.subr.mxu1 %v371_v54 }
  0x2b   : > { %590 = vmatpush3.msra.mxu1 %v355_v55 }
  0xe4   : > { %v681_v13 = vpop.f32.mrf.mxu0 }
  0xe5   : > { %v319_v18 = vmul.f32 %v681_v13, %v681_v13 }
  0xe6   : > { %v683_v14 = vpop.f32.mrf.mxu0 }
  0xe7   : > { %v313_v15 = vadd.f32 %v683_v14, %v681_v13  ;;  %v320_v16 = vmul.f32 %v683_v14, %v683_v14 }
  0xe8   : > { %v689_v17 = vpop.f32.mrf.mxu0 }
  0xe9   : > { %314 = vadd.xlane.f32.xlu0 %v313_v15  ;;  %v323_v21 = vadd.f32 %v320_v16, %v319_v18  ;;  %v321_v23 = vmul.f32 %v689_v17, %v689_v17 }
  0xea   : > { %v693_v19 = vpop.f32.mrf.mxu0 }
  0xeb   : > { %v322_v20 = vmul.f32 %v693_v19, %v693_v19  ;;  %v316_v22 = vadd.f32 %v693_v19, %v689_v17 }
  0xed   : > { %324 = vadd.xlane.f32.xlu0 %v323_v21  ;;  %317 = vadd.xlane.f32.xlu1 %v316_v22  ;;  %v326_v24 = vadd.f32 %v322_v20, %v321_v23 }
  0xf1   : > { %327 = vadd.xlane.f32.xlu1 %v326_v24 }
 0x172   : > { %v315_v56 = vpop.xlane.xlu0 %314 }
 0x173   : > { %v329_v57 = vmul.f32 0.00390625, %v315_v56 }
 0x175   : > { %v333_v60 = vmul.f32 %v329_v57, %v329_v57  ;;  %v339_v8 = vsub.f32 %v681_v13, %v329_v57  ;;  %v340_v9 = vsub.f32 %v683_v14, %v329_v57 }
 0x176   : > { %v325_v58 = vpop.xlane.xlu0 %324  ;;  %v318_v59 = vpop.xlane.xlu1 %317 }
 0x177   : > { %v331_v61 = vmul.f32 0.00390625, %v325_v58  ;;  %v330_v62 = vmul.f32 0.00390625, %v318_v59 }
 0x179   : > { %v335_v63 = vsub.f32 %v331_v61, %v333_v60  ;;  %v334_v2 = vmul.f32 %v330_v62, %v330_v62  ;;  %v341_v15 = vsub.f32 %v689_v17, %v330_v62  ;;  %v342_v16 = vsub.f32 %v693_v19, %v330_v62 }
 0x17a   : > { %v328_v0 = vpop.xlane.xlu1 %327 }
 0x17b   : > { %v337_v1 = vmax.f32 %v335_v63, 0.0  ;;  %v332_v3 = vmul.f32 0.00390625, %v328_v0 }
 0x17d   : > { %v343_v4 = vadd.f32 1e-05, %v337_v1  ;;  %v336_v5 = vsub.f32 %v332_v3, %v334_v2 }
 0x17f   : > { %623 = vrsqrt.f32 %v343_v4  ;;  %v338_v6 = vmax.f32 %v336_v5, 0.0 }
 0x181   : > { %v344_v7 = vadd.f32 1e-05, %v338_v6 }
 0x183   : > { %625 = vrsqrt.f32 %v344_v7 }
 0x18c   : > { %v624_v10 = vpop.eup %623 }
 0x18d   : > { %v348_v11 = vmul.f32 %v624_v10, %v340_v9  ;;  %v347_v12 = vmul.f32 %v624_v10, %v339_v8 }
 0x18f   : > { %v352_v18 = vmax.f32 %v348_v11, 0.0  ;;  %v351_v20 = vmax.f32 %v347_v12, 0.0 }
 0x190   : > { %v626_v21 = vpop.eup %625 }
 0x191   : > { %451 = vmatprep.mubr.f32.mxu1 %v352_v18  ;;  %v350_v22 = vmul.f32 %v626_v21, %v342_v16  ;;  %v349_v23 = vmul.f32 %v626_v21, %v341_v15 }
 0x192   : > { %452 = vmatmul.mubr.f32.vlgmr.msra.gmra.mxu1 %v351_v20 }
 0x193   : > { %v354_v24 = vmax.f32 %v350_v22, 0.0  ;;  %v353_v25 = vmax.f32 %v349_v23, 0.0 }
 0x195   : > { %456 = vmatprep.mubr.f32.mxu1 %v354_v24 }
 0x196   : > { %457 = vmatmul.mubr.f32.gmra.mxu1 %v353_v25 }
 0x252   : > { %v591_v13 = vpop.f32.mrf.mxu1 }
 0x254   : > { %v592_v14 = vpop.f32.mrf.mxu1 }
 0x255   : > { %v593_v17 = vadd.f32 %v592_v14, %v591_v13 }
 0x256   : > { %v594_v26 = vpop.f32.mrf.mxu1 }
 0x258   : > { %v595_v27 = vpop.f32.mrf.mxu1 }
 0x259   : > { %v596_v28 = vadd.f32 %v595_v27, %v594_v26 }
 0x25b   : > { %v557_v19 = vpack.c.bf16 %v596_v28, %v593_v17 }
 0x25d   : > { %558 = vst [vmem:[%s197_s13] sm:$0xff] %v557_v19  }
 0x25e PF: > { %s14_s15 = sadd.s32 1, %s633_s15  }
 0x25f   : > { %p11_p4 = scmp.ge.s32.totalorder %s14_s15, 4  }
 0x261   :  { %13 = sbr.rel (!%p11_p4) target bundleno = 1 (0x1), region = 66 }

// kernel: generator_forward.12
= control target key start
LH: loop header
LB: loop body
LE: loop exit
PB: predicated region body
PF: predicated region fallthrough
CT: control target
= control target key end

     0   :  { %s755_s15 = smov 0   ;;  %s862_s0 = inlined_call_operand.vmem [shape: bf16[2,144,128], index: 0, kind: input, shape index: {}]   ;;  %s863_s1 = inlined_call_operand.vmem [shape: bf16[32,144], index: 1, kind: input, shape index: {}]   ;;  %s864_s2 = inlined_call_operand.vmem [shape: f32[32,1], index: 2, kind: input, shape index: {}]   ;;  %s865_s3 = inlined_call_operand.vmem [shape: f32[128,128], index: 3, kind: input, shape index: {}]   ;;  %s866_s4 = inlined_call_operand.vmem [shape: bf16[2,32,128], index: 4, kind: output, shape index: {}]  }
   0x1 LB: > { %s585_s16 = sadd.s32 4294967295, %s727_s15   ;;  %p589_p0 = scmp.ge.s32.totalorder %s727_s15, 1  ;;  %s727_s15 = sphi %s755_s15, %s14_s15  }
   0x2   : > { %p162_p1 = scmp.lt.s32.totalorder %s727_s15, 3 }
   0x4   : > { %p163_p2 = pnand %p589_p0, %p162_p1 }
   0x5   : > { %p188_p3 = scmp.lt.s32.totalorder (!%p163_p2), %s585_s16, 1 }
   0x6   : > { %166 = sbr.rel (%p163_p2) target bundleno = 622 (0x26e), region = 36 }
   0xb   : > { %v729_v0 = vmov 0   ;;  %v709_v1 = vld [vmem:[%s863_s1 + $0x4] ss:$8 sps:$4 sm:$0xff]   ;;  %vm293_vm0 = vcmask 130048   ;;  %s868_s16 = smov (!%p188_p3, %s585_s16), 1  ;;  %v424_v22 = vld [vmem:[%s865_s3 + $0x78] sm:$0xff] }
   0xc   : > { %300 = vmatprep.subr.bf16.mxu0 %v729_v0  ;;  %606 = vmatprep.mubr.msk.bf16.mxu0 %vm293_vm0, %v709_v1  ;;  %s688_s18 = smul.u32 72, %s868_s16  ;;  %v707_v11 = vld [vmem:[%s863_s1] ss:$8 sps:$4 sm:$0xff]   ;;  %v710_v12 = vld [vmem:[%s863_s1 + $0x14] ss:$8 sps:$4 sm:$0xff]   ;;  %s614_s9 = sshll.u32 %s868_s16, 4 }
   0xd   : > { %v712_v13 = vld [vmem:[%s863_s1 + $0x10] ss:$8 sps:$4 sm:$0xff]   ;;  %650 = vmatprep.subr.mxu1 %v424_v22  ;;  %v422_v27 = vld [vmem:[%s865_s3 + $0x68] sm:$0xff]  ;;  %v421_v29 = vld [vmem:[%s865_s3 + $0x60] sm:$0xff]  ;;  %s197_s12 = scalar_lea.vmem %s866_s4, %s614_s9 }
   0xe   : > { %s192_s21 = scalar_lea.vmem %s862_s0, %s688_s18  ;;  %651 = vmatpush3.msra.mxu1 %v424_v22  ;;  %v423_v25 = vld [vmem:[%s865_s3 + $0x70] sm:$0xff]  ;;  %v420_v30 = vld [vmem:[%s865_s3 + $0x58] sm:$0xff]  ;;  %v418_v32 = vld [vmem:[%s865_s3 + $0x48] sm:$0xff] }
   0xf   : > { %v698_v2 = vld [vmem:[%s192_s21 + $0x38] sm:$0xff]   ;;  %v699_v3 = vld [vmem:[%s192_s21 + $0x30] sm:$0xff]   ;;  %v700_v4 = vld [vmem:[%s192_s21 + $0x28] sm:$0xff]   ;;  %652 = vmatprep.subr.mxu1 %v423_v25 }
  0x10   : > { %301 = vmatpush1.bf16.msra.mxu0 %v698_v2  ;;  %v701_v5 = vld [vmem:[%s192_s21 + $0x20] sm:$0xff]   ;;  %v702_v6 = vld [vmem:[%s192_s21 + $0x18] sm:$0xff]   ;;  %v703_v7 = vld [vmem:[%s192_s21 + $0x10] sm:$0xff]   ;;  %653 = vmatpush3.msra.mxu1 %v423_v25 }
  0x11   : > { %302 = vmatprep.subr.bf16.mxu0 %v729_v0  ;;  %v704_v8 = vld [vmem:[%s192_s21 + $0x8] sm:$0xff]   ;;  %v705_v9 = vld [vmem:[%s192_s21] sm:$0xff]   ;;  %654 = vmatprep.subr.mxu1 %v422_v27  ;;  %v419_v31 = vld [vmem:[%s865_s3 + $0x50] sm:$0xff] }
  0x12   : > { %v706_v10 = vld [vmem:[%s192_s21 + $0x40] sm:$0xff]   ;;  %655 = vmatpush3.msra.mxu1 %v422_v27  ;;  %v416_v34 = vld [vmem:[%s865_s3 + $0x38] sm:$0xff]  ;;  %v415_v35 = vld [vmem:[%s865_s3 + $0x30] sm:$0xff] }
  0x13   : > { %656 = vmatprep.subr.mxu1 %v421_v29  ;;  %v417_v33 = vld [vmem:[%s865_s3 + $0x40] sm:$0xff]  ;;  %v414_v36 = vld [vmem:[%s865_s3 + $0x28] sm:$0xff]  ;;  %v412_v38 = vld [vmem:[%s865_s3 + $0x18] sm:$0xff] }
  0x14   : > { %303 = vmatpush1.bf16.msra.mxu0 %v699_v3  ;;  %657 = vmatpush3.msra.mxu1 %v421_v29  ;;  %v413_v37 = vld [vmem:[%s865_s3 + $0x20] sm:$0xff]  ;;  %v411_v39 = vld [vmem:[%s865_s3 + $0x10] sm:$0xff]  ;;  %v410_v40 = vld [vmem:[%s865_s3 + $0x8] sm:$0xff] }
  0x15   : > { %304 = vmatprep.subr.bf16.mxu0 %v729_v0  ;;  %658 = vmatprep.subr.mxu1 %v420_v30  ;;  %v409_v41 = vld [vmem:[%s865_s3] sm:$0xff] }
  0x16   : > { %659 = vmatpush3.msra.mxu1 %v420_v30 }
  0x17   : > { %660 = vmatprep.subr.mxu1 %v419_v31 }
  0x18   : > { %305 = vmatpush1.bf16.msra.mxu0 %v700_v4  ;;  %661 = vmatpush3.msra.mxu1 %v419_v31 }
  0x19   : > { %306 = vmatprep.subr.bf16.mxu0 %v729_v0  ;;  %662 = vmatprep.subr.mxu1 %v418_v32 }
  0x1a   : > { %663 = vmatpush3.msra.mxu1 %v418_v32 }
  0x1b   : > { %664 = vmatprep.subr.mxu1 %v417_v33 }
  0x1c   : > { %307 = vmatpush1.bf16.msra.mxu0 %v701_v5  ;;  %665 = vmatpush3.msra.mxu1 %v417_v33 }
  0x1d   : > { %308 = vmatprep.subr.bf16.mxu0 %v729_v0  ;;  %666 = vmatprep.subr.mxu1 %v416_v34 }
  0x1e   : > { %667 = vmatpush3.msra.mxu1 %v416_v34 }
  0x1f   : > { %668 = vmatprep.subr.mxu1 %v415_v35 }
  0x20   : > { %309 = vmatpush1.bf16.msra.mxu0 %v702_v6  ;;  %669 = vmatpush3.msra.mxu1 %v415_v35 }
  0x21   : > { %310 = vmatprep.subr.bf16.mxu0 %v729_v0  ;;  %670 = vmatprep.subr.mxu1 %v414_v36 }
  0x22   : > { %671 = vmatpush3.msra.mxu1 %v414_v36 }
  0x23   : > { %672 = vmatprep.subr.mxu1 %v413_v37 }
  0x24   : > { %311 = vmatpush1.bf16.msra.mxu0 %v703_v7  ;;  %673 = vmatpush3.msra.mxu1 %v413_v37 }
  0x25   : > { %312 = vmatprep.subr.bf16.mxu0 %v729_v0  ;;  %674 = vmatprep.subr.mxu1 %v412_v38 }
  0x26   : > { %675 = vmatpush3.msra.mxu1 %v412_v38 }
  0x27   : > { %676 = vmatprep.subr.mxu1 %v411_v39 }
  0x28   : > { %313 = vmatpush1.bf16.msra.mxu0 %v704_v8  ;;  %677 = vmatpush3.msra.mxu1 %v411_v39 }
  0x29   : > { %314 = vmatprep.subr.bf16.mxu0 %v729_v0  ;;  %678 = vmatprep.subr.mxu1 %v410_v40 }
  0x2a   : > { %679 = vmatpush3.msra.mxu1 %v410_v40 }
  0x2b   : > { %680 = vmatprep.subr.mxu1 %v409_v41 }
  0x2c   : > { %315 = vmatpush1.bf16.msra.mxu0 %v705_v9  ;;  %681 = vmatpush3.msra.mxu1 %v409_v41 }
  0x2d   : > { %330 = vmatprep.subr.bf16.mxu0 %v729_v0 }
  0x30   : > { %331 = vmatpush2.bf16.msra.mxu0 %v706_v10 }
  0x33   : > { %333 = vmatmul.mubr.bf16.vlgmr.msra.gmra.mxu0 %v707_v11 }
  0x34   : > { %607 = vmatprep.mubr.msk.bf16.mxu0 %vm293_vm0, %v710_v12 }
  0x3b   : > { %341 = vmatmul.mubr.bf16.gmra.mxu0 %v712_v13 }
  0xf3   : > { %v783_v14 = vpop.f32.mrf.mxu0 }
  0xf4   : > { %349 = vadd.xlane.f32.xlu0 %v783_v14  ;;  %v357_v15 = vmul.f32 %v783_v14, %v783_v14 }
  0xf5   : > { %v336_v16 = vpop.f32.mrf.mxu0 }
  0xf6   : > { %361 = vadd.xlane.f32.xlu1 %v357_v15 }
  0xf7   : > { %v788_v17 = vpop.f32.mrf.mxu0 }
  0xf8   : > { %351 = vadd.xlane.f32.xlu0 %v788_v17  ;;  %v358_v18 = vmul.f32 %v788_v17, %v788_v17 }
  0xf9   : > { %v339_v19 = vpop.f32.mrf.mxu0 }
  0xfa   : > { %363 = vadd.xlane.f32.xlu1 %v358_v18 }
  0xfb   : > { %v793_v20 = vpop.f32.mrf.mxu0 }
  0xfc   : > { %353 = vadd.xlane.f32.xlu0 %v793_v20  ;;  %v359_v23 = vmul.f32 %v793_v20, %v793_v20 }
  0xfd   : > { %v344_v21 = vpop.f32.mrf.mxu0 }
  0xff   : > { %v801_v24 = vpop.f32.mrf.mxu0 }
 0x100   : > { %365 = vadd.xlane.f32.xlu0 %v359_v23  ;;  %355 = vadd.xlane.f32.xlu1 %v801_v24  ;;  %v360_v28 = vmul.f32 %v801_v24, %v801_v24 }
 0x101   : > { %v347_v26 = vpop.f32.mrf.mxu0 }
 0x104   : > { %367 = vadd.xlane.f32.xlu1 %v360_v28 }
 0x17d   : > { %v350_v42 = vpop.xlane.xlu0 %349 }
 0x17e   : > { %v369_v43 = vmul.f32 0.015625, %v350_v42 }
 0x17f   : > { %v362_v44 = vpop.xlane.xlu1 %361 }
 0x180   : > { %v377_v45 = vmul.f32 %v369_v43, %v369_v43  ;;  %v373_v46 = vmul.f32 0.015625, %v362_v44  ;;  %v389_v10 = vsub.f32 %v783_v14, %v369_v43 }
 0x181   : > { %v352_v47 = vpop.xlane.xlu0 %351 }
 0x182   : > { %v381_v48 = vsub.f32 %v373_v46, %v377_v45  ;;  %v370_v49 = vmul.f32 0.015625, %v352_v47 }
 0x183   : > { %v364_v50 = vpop.xlane.xlu1 %363 }
 0x184   : > { %v385_v51 = vmax.f32 %v381_v48, 0.0  ;;  %v378_v52 = vmul.f32 %v370_v49, %v370_v49  ;;  %v374_v53 = vmul.f32 0.015625, %v364_v50  ;;  %v390_v13 = vsub.f32 %v788_v17, %v370_v49 }
 0x185   : > { %v354_v54 = vpop.xlane.xlu0 %353 }
 0x186   : > { %v393_v55 = vadd.f32 1e-05, %v385_v51  ;;  %v382_v56 = vsub.f32 %v374_v53, %v378_v52  ;;  %v371_v57 = vmul.f32 0.015625, %v354_v54 }
 0x188   : > { %713 = vrsqrt.f32 %v393_v55  ;;  %v386_v58 = vmax.f32 %v382_v56, 0.0  ;;  %v379_v62 = vmul.f32 %v371_v57, %v371_v57  ;;  %v391_v21 = vsub.f32 %v793_v20, %v371_v57 }
 0x189   : > { %v366_v59 = vpop.xlane.xlu0 %365  ;;  %v356_v60 = vpop.xlane.xlu1 %355 }
 0x18a   : > { %v394_v61 = vadd.f32 1e-05, %v386_v58  ;;  %v375_v63 = vmul.f32 0.015625, %v366_v59  ;;  %v372_v0 = vmul.f32 0.015625, %v356_v60 }
 0x18c   : > { %715 = vrsqrt.f32 %v394_v61  ;;  %v383_v1 = vsub.f32 %v375_v63, %v379_v62  ;;  %v380_v4 = vmul.f32 %v372_v0, %v372_v0  ;;  %v392_v25 = vsub.f32 %v801_v24, %v372_v0 }
 0x18d   : > { %v368_v2 = vpop.xlane.xlu1 %367 }
 0x18e   : > { %v387_v3 = vmax.f32 %v383_v1, 0.0  ;;  %v376_v5 = vmul.f32 0.015625, %v368_v2 }
 0x190   : > { %v395_v6 = vadd.f32 1e-05, %v387_v3  ;;  %v384_v7 = vsub.f32 %v376_v5, %v380_v4 }
 0x192   : > { %717 = vrsqrt.f32 %v395_v6  ;;  %v388_v8 = vmax.f32 %v384_v7, 0.0 }
 0x194   : > { %v396_v9 = vadd.f32 1e-05, %v388_v8 }
 0x195   : > { %v714_v11 = vpop.eup %713 }
 0x196   : > { %719 = vrsqrt.f32 %v396_v9  ;;  %v401_v12 = vmul.f32 %v714_v11, %v389_v10 }
 0x198   : > { %v405_v15 = vmax.f32 %v401_v12, 0.0 }
 0x199   : > { %v716_v16 = vpop.eup %715 }
 0x19a   : > { %682 = vmatprep.mubr.f32.mxu1 %v405_v15  ;;  %v402_v18 = vmul.f32 %v716_v16, %v390_v13 }
 0x19c   : > { %v406_v19 = vmax.f32 %v402_v18, 0.0 }
 0x19e   : > { %683 = vmatmul.mubr.f32.vlgmr.msra.gmra.mxu1 %v406_v19 }
 0x19f   : > { %v718_v22 = vpop.eup %717 }
 0x1a0   : > { %v403_v23 = vmul.f32 %v718_v22, %v391_v21 }
 0x1a2   : > { %v407_v26 = vmax.f32 %v403_v23, 0.0 }
 0x1a3   : > { %v720_v14 = vpop.eup %719 }
 0x1a4   : > { %685 = vmatprep.mubr.f32.mxu1 %v407_v26  ;;  %v404_v27 = vmul.f32 %v720_v14, %v392_v25 }
 0x1a6   : > { %v408_v28 = vmax.f32 %v404_v27, 0.0 }
 0x1a8   : > { %686 = vmatmul.mubr.f32.gmra.mxu1 %v408_v28 }
 0x25e   : > { %v684_v17 = vpop.f32.mrf.mxu1 }
 0x260   : > { %v491_v29 = vpop.f32.mrf.mxu1 }
 0x261   : > { %v622_v30 = vpack.c.bf16 %v684_v17, %v491_v29 }
 0x263   : > { %623 = vst [vmem:[%s197_s12] sm:$0xff] %v622_v30  }
 0x268   : > { %v687_v20 = vpop.f32.mrf.mxu1 }
 0x26a   : > { %v501_v31 = vpop.f32.mrf.mxu1 }
 0x26b   : > { %v627_v32 = vpack.c.bf16 %v687_v20, %v501_v31 }
 0x26d   : > { %629 = vst [vmem:[%s197_s12 + $0x8] sm:$0xff] %v627_v32  }
 0x26e PF: > { %s14_s15 = sadd.s32 1, %s727_s15  }
 0x26f   : > { %p11_p4 = scmp.ge.s32.totalorder %s14_s15, 4  }
 0x271   :  { %13 = sbr.rel (!%p11_p4) target bundleno = 1 (0x1), region = 66 }

// kernel: generator_forward.13
= control target key start
LH: loop header
LB: loop body
LE: loop exit
PB: predicated region body
PF: predicated region fallthrough
CT: control target
= control target key end

     0   :  { %s761_s12 = smov 0   ;;  %s834_s0 = inlined_call_operand.vmem [shape: bf16[2,288,128], index: 0, kind: input, shape index: {}]   ;;  %s835_s1 = inlined_call_operand.vmem [shape: bf16[32,288], index: 1, kind: input, shape index: {}]   ;;  %s836_s2 = inlined_call_operand.vmem [shape: f32[32,1], index: 2, kind: input, shape index: {}]   ;;  %s837_s3 = inlined_call_operand.vmem [shape: bf16[2,32,128], index: 3, kind: output, shape index: {}]  }
   0x1 LB: > { %s594_s13 = sadd.s32 4294967295, %s739_s12   ;;  %p598_p0 = scmp.ge.s32.totalorder %s739_s12, 1  ;;  %s739_s12 = sphi %s761_s12, %s13_s12  }
   0x2   : > { %p137_p1 = scmp.lt.s32.totalorder %s739_s12, 3 }
   0x4   : > { %p138_p2 = pnand %p598_p0, %p137_p1 }
   0x5   : > { %p161_p3 = scmp.lt.s32.totalorder (!%p138_p2), %s594_s13, 1 }
   0x6   : > { %141 = sbr.rel (%p138_p2) target bundleno = 432 (0x1b0), region = 32 }
   0xb   : > { %vm354_vm0 = vcmask 261120   ;;  %v715_v0 = vld [vmem:[%s835_s1 + $0x8] ss:$12 sps:$4 sm:$0xff]   ;;  %s839_s13 = smov (!%p161_p3, %s594_s13), 1  ;;  %v721_v1 = vld [vmem:[%s835_s1 + $0x4] ss:$12 sps:$4 sm:$0xff]  }
   0xc   : > { %686 = vmatprep.mubr.msk.bf16.mxu1 %vm354_vm0, %v715_v0  ;;  %s690_s17 = smul.u32 144, %s839_s13  ;;  %393 = vmatprep.mubr.bf16.mxu0 %v721_v1  ;;  %v717_v15 = vld [vmem:[%s835_s1 + $0x20] ss:$12 sps:$4 sm:$0xff]   ;;  %v722_v22 = vld [vmem:[%s835_s1 + $0x1c] ss:$12 sps:$4 sm:$0xff]   ;;  %s634_s29 = sshll.u32 %s839_s13, 4 }
   0xd   : > { %v719_v21 = vld [vmem:[%s835_s1] ss:$12 sps:$4 sm:$0xff]   ;;  %v724_v23 = vld [vmem:[%s835_s1 + $0x18] ss:$12 sps:$4 sm:$0xff]   ;;  %s170_s5 = scalar_lea.vmem %s837_s3, %s634_s29 }
   0xe   : > { %s782_s20 = scalar_lea.vmem %s834_s0, %s690_s17 }
   0xf   : > { %v699_v2 = vld [vmem:[%s782_s20 + $0x78] sm:$0xff]   ;;  %v701_v4 = vld [vmem:[%s782_s20 + $0x70] sm:$0xff]   ;;  %v703_v6 = vld [vmem:[%s782_s20 + $0x68] sm:$0xff]  }
  0x10   : > { %v700_v3 = vld [vmem:[%s782_s20 + $0x38] sm:$0xff]   ;;  %650 = vmatprep.subr.bf16.mxu0 %v699_v2  ;;  %v702_v5 = vld [vmem:[%s782_s20 + $0x30] sm:$0xff]   ;;  %v704_v7 = vld [vmem:[%s782_s20 + $0x28] sm:$0xff]  }
  0x11   : > { %651 = vmatpush3.bf16.msra.mxu0 %v700_v3  ;;  %v705_v8 = vld [vmem:[%s782_s20 + $0x60] sm:$0xff]   ;;  %v710_v10 = vld [vmem:[%s782_s20 + $0x88] sm:$0xff]   ;;  %v707_v11 = vld [vmem:[%s782_s20 + $0x58] sm:$0xff]  }
  0x12   : > { %652 = vmatprep.subr.bf16.mxu0 %v701_v4  ;;  %v706_v9 = vld [vmem:[%s782_s20 + $0x20] sm:$0xff]   ;;  %682 = vmatprep.subr.bf16.mxu1 %v710_v10  ;;  %v708_v13 = vld [vmem:[%s782_s20 + $0x18] sm:$0xff]   ;;  %v709_v14 = vld [vmem:[%s782_s20 + $0x50] sm:$0xff]  }
  0x13   : > { %683 = vmatpush3.bf16.msra.mxu1 %v710_v10  ;;  %v713_v12 = vld [vmem:[%s782_s20 + $0x80] sm:$0xff]   ;;  %v711_v16 = vld [vmem:[%s782_s20 + $0x10] sm:$0xff]   ;;  %v712_v17 = vld [vmem:[%s782_s20 + $0x48] sm:$0xff]  }
  0x14   : > { %684 = vmatprep.subr.bf16.mxu1 %v713_v12  ;;  %v714_v18 = vld [vmem:[%s782_s20 + $0x8] sm:$0xff]   ;;  %v716_v19 = vld [vmem:[%s782_s20 + $0x40] sm:$0xff]  }
  0x15   : > { %653 = vmatpush3.bf16.msra.mxu0 %v702_v5  ;;  %v718_v20 = vld [vmem:[%s782_s20] sm:$0xff]  }
  0x16   : > { %654 = vmatprep.subr.bf16.mxu0 %v703_v6 }
  0x17   : > { %685 = vmatpush3.bf16.msra.mxu1 %v713_v12 }
  0x19   : > { %655 = vmatpush3.bf16.msra.mxu0 %v704_v7 }
  0x1a   : > { %656 = vmatprep.subr.bf16.mxu0 %v705_v8  ;;  %687 = vmatmul.mubr.msk.bf16.vlgmr.msra.gmra.mxu1 %vm354_vm0, %v717_v15 }
  0x1d   : > { %657 = vmatpush3.bf16.msra.mxu0 %v706_v9 }
  0x1e   : > { %658 = vmatprep.subr.bf16.mxu0 %v707_v11 }
  0x21   : > { %659 = vmatpush3.bf16.msra.mxu0 %v708_v13 }
  0x22   : > { %660 = vmatprep.subr.bf16.mxu0 %v709_v14 }
  0x25   : > { %661 = vmatpush3.bf16.msra.mxu0 %v711_v16 }
  0x26   : > { %662 = vmatprep.subr.bf16.mxu0 %v712_v17 }
  0x29   : > { %663 = vmatpush3.bf16.msra.mxu0 %v714_v18 }
  0x2a   : > { %664 = vmatprep.subr.bf16.mxu0 %v716_v19 }
  0x2d   : > { %665 = vmatpush3.bf16.msra.mxu0 %v718_v20 }
  0x30   : > { %394 = vmatmul.mubr.bf16.vlgmr.msra.gmra.mxu0 %v719_v21 }
  0x31   : > { %401 = vmatprep.mubr.bf16.mxu0 %v722_v22 }
  0x38   : > { %402 = vmatmul.mubr.bf16.gmra.mxu0 %v724_v23 }
  0xda   : > { %v688_v24 = vpop.f32.mrf.mxu1 }
  0xdc   : > { %v444_v25 = vpop.f32.mrf.mxu1 }
  0xde   : > { %v689_v29 = vpop.f32.mrf.mxu1 }
  0xe0   : > { %v447_v34 = vpop.f32.mrf.mxu1 }
  0xf0   : > { %v666_v26 = vpop.f32.mrf.mxu0 }
  0xf2   : > { %v667_v27 = vpop.f32.mrf.mxu0 }
  0xf3   : > { %v668_v28 = vadd.f32 %v667_v27, %v666_v26 }
  0xf4   : > { %v669_v30 = vpop.f32.mrf.mxu0 }
  0xf5   : > { %v815_v31 = vadd.f32 %v668_v28, %v444_v25 }
  0xf6   : > { %v670_v32 = vpop.f32.mrf.mxu0 }
  0xf7   : > { %v671_v33 = vadd.f32 %v670_v32, %v669_v30  ;;  %459 = vadd.xlane.f32.xlu0 %v815_v31  ;;  %v467_v37 = vmul.f32 %v815_v31, %v815_v31 }
  0xf8   : > { %v672_v35 = vpop.f32.mrf.mxu0 }
  0xf9   : > { %v448_v36 = vadd.f32 %v671_v33, %v447_v34 }
  0xfa   : > { %v673_v38 = vpop.f32.mrf.mxu0 }
  0xfb   : > { %v674_v39 = vadd.f32 %v673_v38, %v672_v35  ;;  %471 = vadd.xlane.f32.xlu0 %v467_v37  ;;  %v468_v40 = vmul.f32 %v448_v36, %v448_v36 }
  0xfc   : > { %v675_v41 = vpop.f32.mrf.mxu0 }
  0xfd   : > { %v820_v42 = vadd.f32 %v688_v24, %v674_v39  ;;  %473 = vadd.xlane.f32.xlu1 %v468_v40 }
  0xfe   : > { %v676_v43 = vpop.f32.mrf.mxu0 }
  0xff   : > { %v677_v44 = vadd.f32 %v676_v43, %v675_v41  ;;  %461 = vadd.xlane.f32.xlu0 %v448_v36  ;;  %v469_v45 = vmul.f32 %v820_v42, %v820_v42 }
 0x101   : > { %463 = vadd.xlane.f32.xlu1 %v820_v42  ;;  %v456_v46 = vadd.f32 %v689_v29, %v677_v44 }
 0x103   : > { %475 = vadd.xlane.f32.xlu0 %v469_v45  ;;  %v470_v47 = vmul.f32 %v456_v46, %v456_v46 }
 0x105   : > { %465 = vadd.xlane.f32.xlu1 %v456_v46 }
 0x109   : > { %477 = vadd.xlane.f32.xlu1 %v470_v47 }
 0x180   : > { %v460_v48 = vpop.xlane.xlu0 %459 }
 0x181   : > { %v479_v49 = vmul.f32 0.0625, %v460_v48 }
 0x183   : > { %v487_v51 = vmul.f32 %v479_v49, %v479_v49  ;;  %v499_v17 = vsub.f32 %v815_v31, %v479_v49 }
 0x184   : > { %v472_v50 = vpop.xlane.xlu0 %471 }
 0x185   : > { %v483_v52 = vmul.f32 0.0625, %v472_v50 }
 0x186   : > { %v474_v53 = vpop.xlane.xlu1 %473 }
 0x187   : > { %v491_v54 = vsub.f32 %v483_v52, %v487_v51  ;;  %v484_v60 = vmul.f32 0.0625, %v474_v53 }
 0x188   : > { %v462_v55 = vpop.xlane.xlu0 %461 }
 0x189   : > { %v495_v56 = vmax.f32 %v491_v54, 0.0  ;;  %v480_v57 = vmul.f32 0.0625, %v462_v55 }
 0x18a   : > { %v464_v58 = vpop.xlane.xlu1 %463 }
 0x18b   : > { %v503_v59 = vadd.f32 1e-05, %v495_v56  ;;  %v488_v61 = vmul.f32 %v480_v57, %v480_v57  ;;  %v481_v62 = vmul.f32 0.0625, %v464_v58  ;;  %v500_v19 = vsub.f32 %v448_v36, %v480_v57 }
 0x18c   : > { %v476_v63 = vpop.xlane.xlu0 %475 }
 0x18d   : > { %v492_v0 = vsub.f32 %v484_v60, %v488_v61  ;;  %v489_v1 = vmul.f32 %v481_v62, %v481_v62  ;;  %v485_v2 = vmul.f32 0.0625, %v476_v63  ;;  %725 = vrsqrt.f32 %v503_v59 }
 0x18e   : > { %v466_v3 = vpop.xlane.xlu1 %465  ;;  %v501_v26 = vsub.f32 %v820_v42, %v481_v62 }
 0x18f   : > { %v496_v4 = vmax.f32 %v492_v0, 0.0  ;;  %v482_v5 = vmul.f32 0.0625, %v466_v3  ;;  %v493_v6 = vsub.f32 %v485_v2, %v489_v1 }
 0x191   : > { %v504_v7 = vadd.f32 1e-05, %v496_v4  ;;  %v497_v8 = vmax.f32 %v493_v6, 0.0  ;;  %v490_v10 = vmul.f32 %v482_v5, %v482_v5  ;;  %v502_v28 = vsub.f32 %v456_v46, %v482_v5 }
 0x192   : > { %v478_v9 = vpop.xlane.xlu1 %477 }
 0x193   : > { %727 = vrsqrt.f32 %v504_v7  ;;  %v486_v11 = vmul.f32 0.0625, %v478_v9  ;;  %v505_v12 = vadd.f32 1e-05, %v497_v8 }
 0x195   : > { %v494_v13 = vsub.f32 %v486_v11, %v490_v10  ;;  %729 = vrsqrt.f32 %v505_v12 }
 0x197   : > { %v498_v14 = vmax.f32 %v494_v13, 0.0 }
 0x199   : > { %v506_v15 = vadd.f32 1e-05, %v498_v14 }
 0x19a   : > { %v726_v16 = vpop.eup %725 }
 0x19b   : > { %731 = vrsqrt.f32 %v506_v15  ;;  %v511_v18 = vmul.f32 %v726_v16, %v499_v17 }
 0x19d   : > { %v515_v22 = vmax.f32 %v511_v18, 0.0 }
 0x1a0   : > { %v728_v20 = vpop.eup %727 }
 0x1a1   : > { %v512_v21 = vmul.f32 %v728_v20, %v500_v19 }
 0x1a2   : > { %v730_v24 = vpop.eup %729 }
 0x1a3   : > { %v516_v23 = vmax.f32 %v512_v21, 0.0  ;;  %v513_v27 = vmul.f32 %v730_v24, %v501_v26 }
 0x1a5   : > { %v642_v25 = vpack.c.bf16 %v516_v23, %v515_v22  ;;  %v517_v31 = vmax.f32 %v513_v27, 0.0 }
 0x1a7   : > { %643 = vst [vmem:[%s170_s5] sm:$0xff] %v642_v25  }
 0x1a8   : > { %v732_v29 = vpop.eup %731 }
 0x1a9   : > { %v514_v30 = vmul.f32 %v732_v29, %v502_v28 }
 0x1ab   : > { %v518_v32 = vmax.f32 %v514_v30, 0.0 }
 0x1ad   : > { %v647_v33 = vpack.c.bf16 %v518_v32, %v517_v31 }
 0x1af   : > { %649 = vst [vmem:[%s170_s5 + $0x8] sm:$0xff] %v647_v33  }
 0x1b0 PF: > { %s13_s12 = sadd.s32 1, %s739_s12  }
 0x1b1   : > { %p10_p4 = scmp.ge.s32.totalorder %s13_s12, 4  }
 0x1b3   :  { %12 = sbr.rel (!%p10_p4) target bundleno = 1 (0x1), region = 62 }

// kernel: generator_forward.14
= control target key start
LH: loop header
LB: loop body
LE: loop exit
PB: predicated region body
PF: predicated region fallthrough
CT: control target
= control target key end

     0   :  { %s845_s15 = smov 0   ;;  %s933_s0 = inlined_call_operand.vmem [shape: bf16[2,288,128], index: 0, kind: input, shape index: {}]   ;;  %s934_s1 = inlined_call_operand.vmem [shape: bf16[32,288], index: 1, kind: input, shape index: {}]   ;;  %s935_s2 = inlined_call_operand.vmem [shape: f32[32,1], index: 2, kind: input, shape index: {}]   ;;  %s936_s3 = inlined_call_operand.vmem [shape: bf16[2,32,128], index: 3, kind: input, shape index: {}]   ;;  %s937_s4 = inlined_call_operand.vmem [shape: bf16[2,32,128], index: 4, kind: output, shape index: {}]  }
   0x1 LB: > { %s661_s16 = sadd.s32 4294967295, %s818_s15   ;;  %p665_p0 = scmp.ge.s32.totalorder %s818_s15, 1  ;;  %s818_s15 = sphi %s845_s15, %s14_s15  }
   0x2   : > { %p172_p1 = scmp.lt.s32.totalorder %s818_s15, 3 }
   0x4   : > { %p173_p2 = pnand %p665_p0, %p172_p1 }
   0x5   : > { %p203_p3 = scmp.lt.s32.totalorder (!%p173_p2), %s661_s16, 1 }
   0x6   : > { %176 = sbr.rel (%p173_p2) target bundleno = 432 (0x1b0), region = 36 }
   0xb   : > { %vm401_vm0 = vcmask 261120   ;;  %v794_v0 = vld [vmem:[%s934_s1 + $0x8] ss:$12 sps:$4 sm:$0xff]   ;;  %s939_s16 = smov (!%p203_p3, %s661_s16), 1  ;;  %v800_v1 = vld [vmem:[%s934_s1 + $0x4] ss:$12 sps:$4 sm:$0xff]  }
   0xc   : > { %765 = vmatprep.mubr.msk.bf16.mxu1 %vm401_vm0, %v794_v0  ;;  %s769_s20 = smul.u32 144, %s939_s16  ;;  %440 = vmatprep.mubr.bf16.mxu0 %v800_v1  ;;  %v796_v15 = vld [vmem:[%s934_s1 + $0x20] ss:$12 sps:$4 sm:$0xff]   ;;  %v801_v22 = vld [vmem:[%s934_s1 + $0x1c] ss:$12 sps:$4 sm:$0xff]   ;;  %s703_s6 = sshll.u32 %s939_s16, 4 }
   0xd   : > { %v798_v21 = vld [vmem:[%s934_s1] ss:$12 sps:$4 sm:$0xff]   ;;  %v803_v23 = vld [vmem:[%s934_s1 + $0x18] ss:$12 sps:$4 sm:$0xff]   ;;  %s212_s9 = scalar_lea.vmem %s936_s3, %s703_s6  ;;  %s217_s12 = scalar_lea.vmem %s937_s4, %s703_s6 }
   0xe   : > { %s866_s23 = scalar_lea.vmem %s933_s0, %s769_s20 }
   0xf   : > { %v778_v2 = vld [vmem:[%s866_s23 + $0x78] sm:$0xff]   ;;  %v780_v4 = vld [vmem:[%s866_s23 + $0x70] sm:$0xff]   ;;  %v782_v6 = vld [vmem:[%s866_s23 + $0x68] sm:$0xff]  }
  0x10   : > { %v779_v3 = vld [vmem:[%s866_s23 + $0x38] sm:$0xff]   ;;  %729 = vmatprep.subr.bf16.mxu0 %v778_v2  ;;  %v781_v5 = vld [vmem:[%s866_s23 + $0x30] sm:$0xff]   ;;  %v783_v7 = vld [vmem:[%s866_s23 + $0x28] sm:$0xff]  }
  0x11   : > { %730 = vmatpush3.bf16.msra.mxu0 %v779_v3  ;;  %v784_v8 = vld [vmem:[%s866_s23 + $0x60] sm:$0xff]   ;;  %v789_v10 = vld [vmem:[%s866_s23 + $0x88] sm:$0xff]   ;;  %v786_v11 = vld [vmem:[%s866_s23 + $0x58] sm:$0xff]  }
  0x12   : > { %731 = vmatprep.subr.bf16.mxu0 %v780_v4  ;;  %v785_v9 = vld [vmem:[%s866_s23 + $0x20] sm:$0xff]   ;;  %761 = vmatprep.subr.bf16.mxu1 %v789_v10  ;;  %v787_v13 = vld [vmem:[%s866_s23 + $0x18] sm:$0xff]   ;;  %v788_v14 = vld [vmem:[%s866_s23 + $0x50] sm:$0xff]  }
  0x13   : > { %762 = vmatpush3.bf16.msra.mxu1 %v789_v10  ;;  %v792_v12 = vld [vmem:[%s866_s23 + $0x80] sm:$0xff]   ;;  %v790_v16 = vld [vmem:[%s866_s23 + $0x10] sm:$0xff]   ;;  %v791_v17 = vld [vmem:[%s866_s23 + $0x48] sm:$0xff]  }
  0x14   : > { %763 = vmatprep.subr.bf16.mxu1 %v792_v12  ;;  %v793_v18 = vld [vmem:[%s866_s23 + $0x8] sm:$0xff]   ;;  %v795_v19 = vld [vmem:[%s866_s23 + $0x40] sm:$0xff]  }
  0x15   : > { %732 = vmatpush3.bf16.msra.mxu0 %v781_v5  ;;  %v797_v20 = vld [vmem:[%s866_s23] sm:$0xff]  }
  0x16   : > { %733 = vmatprep.subr.bf16.mxu0 %v782_v6 }
  0x17   : > { %764 = vmatpush3.bf16.msra.mxu1 %v792_v12 }
  0x19   : > { %734 = vmatpush3.bf16.msra.mxu0 %v783_v7 }
  0x1a   : > { %735 = vmatprep.subr.bf16.mxu0 %v784_v8  ;;  %766 = vmatmul.mubr.msk.bf16.vlgmr.msra.gmra.mxu1 %vm401_vm0, %v796_v15 }
  0x1d   : > { %736 = vmatpush3.bf16.msra.mxu0 %v785_v9 }
  0x1e   : > { %737 = vmatprep.subr.bf16.mxu0 %v786_v11 }
  0x21   : > { %738 = vmatpush3.bf16.msra.mxu0 %v787_v13 }
  0x22   : > { %739 = vmatprep.subr.bf16.mxu0 %v788_v14 }
  0x25   : > { %740 = vmatpush3.bf16.msra.mxu0 %v790_v16 }
  0x26   : > { %741 = vmatprep.subr.bf16.mxu0 %v791_v17  ;;  %v710_v17 = vld [vmem:[%s212_s9] sm:$0xff]  }
  0x29   : > { %742 = vmatpush3.bf16.msra.mxu0 %v793_v18 }
  0x2a   : > { %743 = vmatprep.subr.bf16.mxu0 %v795_v19 }
  0x2d   : > { %744 = vmatpush3.bf16.msra.mxu0 %v797_v20  ;;  %v711_v20 = vunpack.c.l.bf16 %v710_v17 }
  0x30   : > { %441 = vmatmul.mubr.bf16.vlgmr.msra.gmra.mxu0 %v798_v21  ;;  %v712_v21 = vunpack.c.h.bf16 %v710_v17 }
  0x31   : > { %448 = vmatprep.mubr.bf16.mxu0 %v801_v22 }
  0x38   : > { %449 = vmatmul.mubr.bf16.gmra.mxu0 %v803_v23 }
  0xda   : > { %v767_v24 = vpop.f32.mrf.mxu1 }
  0xdc   : > { %v491_v25 = vpop.f32.mrf.mxu1 }
  0xde   : > { %v768_v29 = vpop.f32.mrf.mxu1 }
  0xe0   : > { %v494_v34 = vpop.f32.mrf.mxu1 }
  0xf0   : > { %v745_v26 = vpop.f32.mrf.mxu0 }
  0xf2   : > { %v746_v27 = vpop.f32.mrf.mxu0 }
  0xf3   : > { %v747_v28 = vadd.f32 %v746_v27, %v745_v26 }
  0xf4   : > { %v748_v30 = vpop.f32.mrf.mxu0 }
  0xf5   : > { %v899_v31 = vadd.f32 %v747_v28, %v491_v25  ;;  %v727_v28 = vld [vmem:[%s212_s9 + $0x8] sm:$0xff]  }
  0xf6   : > { %v749_v32 = vpop.f32.mrf.mxu0 }
  0xf7   : > { %v750_v33 = vadd.f32 %v749_v32, %v748_v30  ;;  %506 = vadd.xlane.f32.xlu0 %v899_v31  ;;  %v514_v37 = vmul.f32 %v899_v31, %v899_v31  ;;  %v715_v32 = vunpack.c.l.bf16 %v727_v28 }
  0xf8   : > { %v751_v35 = vpop.f32.mrf.mxu0 }
  0xf9   : > { %v902_v36 = vadd.f32 %v750_v33, %v494_v34 }
  0xfa   : > { %v752_v38 = vpop.f32.mrf.mxu0 }
  0xfb   : > { %v753_v39 = vadd.f32 %v752_v38, %v751_v35  ;;  %518 = vadd.xlane.f32.xlu0 %v514_v37  ;;  %v515_v40 = vmul.f32 %v902_v36, %v902_v36 }
  0xfc   : > { %v754_v41 = vpop.f32.mrf.mxu0 }
  0xfd   : > { %v908_v42 = vadd.f32 %v767_v24, %v753_v39  ;;  %520 = vadd.xlane.f32.xlu1 %v515_v40 }
  0xfe   : > { %v755_v43 = vpop.f32.mrf.mxu0 }
  0xff   : > { %v756_v44 = vadd.f32 %v755_v43, %v754_v41  ;;  %508 = vadd.xlane.f32.xlu0 %v902_v36  ;;  %v516_v45 = vmul.f32 %v908_v42, %v908_v42 }
 0x101   : > { %510 = vadd.xlane.f32.xlu1 %v908_v42  ;;  %v914_v46 = vadd.f32 %v768_v29, %v756_v44 }
 0x103   : > { %522 = vadd.xlane.f32.xlu0 %v516_v45  ;;  %v517_v47 = vmul.f32 %v914_v46, %v914_v46 }
 0x105   : > { %512 = vadd.xlane.f32.xlu1 %v914_v46 }
 0x109   : > { %524 = vadd.xlane.f32.xlu1 %v517_v47 }
 0x180   : > { %v507_v48 = vpop.xlane.xlu0 %506 }
 0x181   : > { %v526_v49 = vmul.f32 0.0625, %v507_v48 }
 0x183   : > { %v534_v51 = vmul.f32 %v526_v49, %v526_v49  ;;  %v546_v18 = vsub.f32 %v899_v31, %v526_v49  ;;  %v716_v31 = vunpack.c.h.bf16 %v727_v28 }
 0x184   : > { %v519_v50 = vpop.xlane.xlu0 %518 }
 0x185   : > { %v530_v52 = vmul.f32 0.0625, %v519_v50 }
 0x186   : > { %v521_v53 = vpop.xlane.xlu1 %520 }
 0x187   : > { %v538_v54 = vsub.f32 %v530_v52, %v534_v51  ;;  %v531_v60 = vmul.f32 0.0625, %v521_v53 }
 0x188   : > { %v509_v55 = vpop.xlane.xlu0 %508 }
 0x189   : > { %v542_v56 = vmax.f32 %v538_v54, 0.0  ;;  %v527_v57 = vmul.f32 0.0625, %v509_v55 }
 0x18a   : > { %v511_v58 = vpop.xlane.xlu1 %510 }
 0x18b   : > { %v550_v59 = vadd.f32 1e-05, %v542_v56  ;;  %v535_v61 = vmul.f32 %v527_v57, %v527_v57  ;;  %v528_v62 = vmul.f32 0.0625, %v511_v58  ;;  %v547_v22 = vsub.f32 %v902_v36, %v527_v57 }
 0x18c   : > { %v523_v63 = vpop.xlane.xlu0 %522 }
 0x18d   : > { %v539_v0 = vsub.f32 %v531_v60, %v535_v61  ;;  %v536_v1 = vmul.f32 %v528_v62, %v528_v62  ;;  %v532_v2 = vmul.f32 0.0625, %v523_v63  ;;  %804 = vrsqrt.f32 %v550_v59 }
 0x18e   : > { %v513_v3 = vpop.xlane.xlu1 %512  ;;  %v548_v30 = vsub.f32 %v908_v42, %v528_v62 }
 0x18f   : > { %v543_v4 = vmax.f32 %v539_v0, 0.0  ;;  %v529_v5 = vmul.f32 0.0625, %v513_v3  ;;  %v540_v6 = vsub.f32 %v532_v2, %v536_v1 }
 0x191   : > { %v551_v7 = vadd.f32 1e-05, %v543_v4  ;;  %v544_v8 = vmax.f32 %v540_v6, 0.0  ;;  %v537_v10 = vmul.f32 %v529_v5, %v529_v5  ;;  %v549_v34 = vsub.f32 %v914_v46, %v529_v5 }
 0x192   : > { %v525_v9 = vpop.xlane.xlu1 %524 }
 0x193   : > { %806 = vrsqrt.f32 %v551_v7  ;;  %v533_v11 = vmul.f32 0.0625, %v525_v9  ;;  %v552_v12 = vadd.f32 1e-05, %v544_v8 }
 0x195   : > { %v541_v13 = vsub.f32 %v533_v11, %v537_v10  ;;  %808 = vrsqrt.f32 %v552_v12 }
 0x197   : > { %v545_v14 = vmax.f32 %v541_v13, 0.0 }
 0x199   : > { %v553_v15 = vadd.f32 1e-05, %v545_v14 }
 0x19a   : > { %v805_v16 = vpop.eup %804 }
 0x19b   : > { %810 = vrsqrt.f32 %v553_v15  ;;  %v558_v19 = vmul.f32 %v805_v16, %v546_v18 }
 0x19d   : > { %v570_v25 = vadd.f32 %v711_v20, %v558_v19 }
 0x1a0   : > { %v807_v23 = vpop.eup %806 }
 0x1a1   : > { %v559_v24 = vmul.f32 %v807_v23, %v547_v22 }
 0x1a2   : > { %v809_v27 = vpop.eup %808 }
 0x1a3   : > { %v571_v26 = vadd.f32 %v712_v21, %v559_v24  ;;  %v560_v33 = vmul.f32 %v809_v27, %v548_v30 }
 0x1a5   : > { %v720_v29 = vpack.c.bf16 %v571_v26, %v570_v25  ;;  %v572_v37 = vadd.f32 %v715_v32, %v560_v33 }
 0x1a7   : > { %721 = vst [vmem:[%s217_s12] sm:$0xff] %v720_v29  }
 0x1a8   : > { %v811_v35 = vpop.eup %810 }
 0x1a9   : > { %v561_v36 = vmul.f32 %v811_v35, %v549_v34 }
 0x1ab   : > { %v573_v38 = vadd.f32 %v716_v31, %v561_v36 }
 0x1ad   : > { %v725_v39 = vpack.c.bf16 %v573_v38, %v572_v37 }
 0x1af   : > { %728 = vst [vmem:[%s217_s12 + $0x8] sm:$0xff] %v725_v39  }
 0x1b0 PF: > { %s14_s15 = sadd.s32 1, %s818_s15  }
 0x1b1   : > { %p11_p4 = scmp.ge.s32.totalorder %s14_s15, 4  }
 0x1b3   :  { %13 = sbr.rel (!%p11_p4) target bundleno = 1 (0x1), region = 69 }

// kernel: generator_forward.17
= control target key start
LH: loop header
LB: loop body
LE: loop exit
PB: predicated region body
PF: predicated region fallthrough
CT: control target
= control target key end

     0   :  { %s658_s12 = smov 0   ;;  %s708_s0 = inlined_call_operand.vmem [shape: bf16[2,288,128], index: 0, kind: input, shape index: {}]   ;;  %s709_s1 = inlined_call_operand.vmem [shape: bf16[16,288], index: 1, kind: input, shape index: {}]   ;;  %s710_s2 = inlined_call_operand.vmem [shape: f32[16,1], index: 2, kind: input, shape index: {}]   ;;  %s711_s3 = inlined_call_operand.vmem [shape: bf16[2,16,128], index: 3, kind: output, shape index: {}]  }
   0x1 LB: > { %s516_s13 = sadd.s32 4294967295, %s634_s12   ;;  %p520_p0 = scmp.ge.s32.totalorder %s634_s12, 1  ;;  %s634_s12 = sphi %s658_s12, %s13_s12  }
   0x2   : > { %p137_p1 = scmp.lt.s32.totalorder %s634_s12, 3 }
   0x4   : > { %p138_p2 = pnand %p520_p0, %p137_p1 }
   0x5   : > { %p161_p3 = scmp.lt.s32.totalorder (!%p138_p2), %s516_s13, 1 }
   0x6   : > { %141 = sbr.rel (%p138_p2) target bundleno = 420 (0x1a4), region = 32 }
   0xb   : > { %v636_v0 = vmov 0.0   ;;  %vm637_vm0 = vmmov 0   ;;  %s713_s13 = smov (!%p161_p3, %s516_s13), 1  ;;  %v623_v1 = vld [vmem:[%s709_s1 + $0x4] ss:$12 sps:$4 sm:$0xff]   ;;  %vm335_vm1 = vcmask 261120  }
   0xc   : > { %583 = vmatprep.subr.bf16.mxu1 %v636_v0  ;;  %587 = vmatprep.mubr.msk.bf16.mxu1 %vm637_vm0, %v636_v0  ;;  %s591_s15 = smul.u32 144, %s713_s13  ;;  %v620_v15 = vld [vmem:[%s709_s1 + $0x8] ss:$12 sps:$4 sm:$0xff]   ;;  %v621_v21 = vld [vmem:[%s709_s1] ss:$12 sps:$4 sm:$0xff]   ;;  %s550_s23 = sshll.u32 %s713_s13, 3 }
   0xd   : > { %371 = vmatprep.mubr.bf16.mxu0 %v623_v1  ;;  %s170_s26 = scalar_lea.vmem %s711_s3, %s550_s23 }
   0xe   : > { %s675_s18 = scalar_lea.vmem %s708_s0, %s591_s15 }
   0xf   : > { %v602_v2 = vld [vmem:[%s675_s18 + $0x78] sm:$0xff]   ;;  %v604_v4 = vld [vmem:[%s675_s18 + $0x70] sm:$0xff]   ;;  %v606_v6 = vld [vmem:[%s675_s18 + $0x68] sm:$0xff]  }
  0x10   : > { %v603_v3 = vld [vmem:[%s675_s18 + $0x38] sm:$0xff]   ;;  %558 = vmatprep.subr.bf16.mxu0 %v602_v2  ;;  %v605_v5 = vld [vmem:[%s675_s18 + $0x30] sm:$0xff]   ;;  %v607_v7 = vld [vmem:[%s675_s18 + $0x28] sm:$0xff]  }
  0x11   : > { %559 = vmatpush3.bf16.msra.mxu0 %v603_v3  ;;  %v608_v8 = vld [vmem:[%s675_s18 + $0x60] sm:$0xff]   ;;  %v610_v10 = vld [vmem:[%s675_s18 + $0x58] sm:$0xff]   ;;  %v614_v11 = vld [vmem:[%s675_s18 + $0x88] sm:$0xff]  }
  0x12   : > { %560 = vmatprep.subr.bf16.mxu0 %v604_v4  ;;  %v609_v9 = vld [vmem:[%s675_s18 + $0x20] sm:$0xff]   ;;  %v611_v12 = vld [vmem:[%s675_s18 + $0x18] sm:$0xff]   ;;  %584 = vmatpush3.bf16.msra.mxu1 %v614_v11  ;;  %v612_v14 = vld [vmem:[%s675_s18 + $0x50] sm:$0xff]  }
  0x13   : > { %585 = vmatprep.subr.bf16.mxu1 %v636_v0  ;;  %v617_v13 = vld [vmem:[%s675_s18 + $0x80] sm:$0xff]   ;;  %v613_v16 = vld [vmem:[%s675_s18 + $0x10] sm:$0xff]   ;;  %v615_v17 = vld [vmem:[%s675_s18 + $0x48] sm:$0xff]  }
  0x14   : > { %v616_v18 = vld [vmem:[%s675_s18 + $0x8] sm:$0xff]   ;;  %v618_v19 = vld [vmem:[%s675_s18 + $0x40] sm:$0xff]  }
  0x15   : > { %561 = vmatpush3.bf16.msra.mxu0 %v605_v5  ;;  %v619_v20 = vld [vmem:[%s675_s18] sm:$0xff]  }
  0x16   : > { %562 = vmatprep.subr.bf16.mxu0 %v606_v6  ;;  %586 = vmatpush3.bf16.msra.mxu1 %v617_v13 }
  0x19   : > { %563 = vmatpush3.bf16.msra.mxu0 %v607_v7  ;;  %588 = vmatmul.mubr.msk.bf16.vlgmr.msra.gmra.mxu1 %vm335_vm1, %v620_v15 }
  0x1a   : > { %564 = vmatprep.subr.bf16.mxu0 %v608_v8 }
  0x1d   : > { %565 = vmatpush3.bf16.msra.mxu0 %v609_v9 }
  0x1e   : > { %566 = vmatprep.subr.bf16.mxu0 %v610_v10 }
  0x21   : > { %567 = vmatpush3.bf16.msra.mxu0 %v611_v12 }
  0x22   : > { %568 = vmatprep.subr.bf16.mxu0 %v612_v14 }
  0x25   : > { %569 = vmatpush3.bf16.msra.mxu0 %v613_v16 }
  0x26   : > { %570 = vmatprep.subr.bf16.mxu0 %v615_v17 }
  0x29   : > { %571 = vmatpush3.bf16.msra.mxu0 %v616_v18 }
  0x2a   : > { %572 = vmatprep.subr.bf16.mxu0 %v618_v19 }
  0x2d   : > { %573 = vmatpush3.bf16.msra.mxu0 %v619_v20 }
  0x30   : > { %372 = vmatmul.mubr.bf16.vlgmr.msra.gmra.mxu0 %v621_v21 }
  0xd9   : > { %v414_v22 = vpop.f32.mrf.mxu1 }
  0xdb   : > { %v589_v23 = vpop.f32.mrf.mxu1 }
  0xdd   : > { %v417_v24 = vpop.f32.mrf.mxu1 }
  0xdf   : > { %v590_v25 = vpop.f32.mrf.mxu1 }
  0xf0   : > { %v574_v26 = vpop.f32.mrf.mxu0 }
  0xf2   : > { %v575_v27 = vpop.f32.mrf.mxu0 }
  0xf3   : > { %v576_v28 = vadd.f32 %v575_v27, %v574_v26 }
  0xf4   : > { %v577_v29 = vpop.f32.mrf.mxu0 }
  0xf5   : > { %v415_v30 = vadd.f32 %v576_v28, %v414_v22 }
  0xf6   : > { %v578_v31 = vpop.f32.mrf.mxu0 }
  0xf7   : > { %v579_v32 = vadd.f32 %v578_v31, %v577_v29  ;;  %421 = vadd.xlane.f32.xlu0 %v415_v30  ;;  %v425_v33 = vmul.f32 %v415_v30, %v415_v30 }
  0xf9   : > { %v418_v34 = vadd.f32 %v579_v32, %v417_v24  ;;  %427 = vadd.xlane.f32.xlu1 %v425_v33 }
  0xfb   : > { %423 = vadd.xlane.f32.xlu0 %v418_v34  ;;  %v426_v35 = vmul.f32 %v418_v34, %v418_v34 }
  0xfd   : > { %429 = vadd.xlane.f32.xlu1 %v426_v35 }
 0x180   : > { %v422_v36 = vpop.xlane.xlu0 %421 }
 0x181   : > { %v431_v37 = vmul.f32 0.015625, %v422_v36 }
 0x182   : > { %v428_v38 = vpop.xlane.xlu1 %427 }
 0x183   : > { %v435_v39 = vmul.f32 %v431_v37, %v431_v37  ;;  %v433_v40 = vmul.f32 0.015625, %v428_v38  ;;  %v441_v53 = vsub.f32 %v415_v30, %v431_v37 }
 0x184   : > { %v424_v41 = vpop.xlane.xlu0 %423 }
 0x185   : > { %v437_v42 = vsub.f32 %v433_v40, %v435_v39  ;;  %v432_v43 = vmul.f32 0.015625, %v424_v41 }
 0x186   : > { %v430_v44 = vpop.xlane.xlu1 %429 }
 0x187   : > { %v439_v45 = vmax.f32 %v437_v42, 0.0  ;;  %v436_v46 = vmul.f32 %v432_v43, %v432_v43  ;;  %v434_v47 = vmul.f32 0.015625, %v430_v44  ;;  %v442_v55 = vsub.f32 %v418_v34, %v432_v43 }
 0x189   : > { %v443_v48 = vadd.f32 1e-05, %v439_v45  ;;  %v438_v49 = vsub.f32 %v434_v47, %v436_v46 }
 0x18b   : > { %624 = vrsqrt.f32 %v443_v48  ;;  %v440_v50 = vmax.f32 %v438_v49, 0.0 }
 0x18d   : > { %v444_v51 = vadd.f32 1e-05, %v440_v50 }
 0x18f   : > { %626 = vrsqrt.f32 %v444_v51 }
 0x198   : > { %v625_v52 = vpop.eup %624 }
 0x199   : > { %v447_v54 = vmul.f32 %v625_v52, %v441_v53 }
 0x19b   : > { %v449_v58 = vmax.f32 %v447_v54, 0.0 }
 0x19c   : > { %v627_v56 = vpop.eup %626 }
 0x19d   : > { %v448_v57 = vmul.f32 %v627_v56, %v442_v55 }
 0x19f   : > { %v450_v59 = vmax.f32 %v448_v57, 0.0 }
 0x1a1   : > { %v556_v60 = vpack.c.bf16 %v450_v59, %v449_v58 }
 0x1a3   : > { %557 = vst [vmem:[%s170_s26] sm:$0xff] %v556_v60  }
 0x1a4 PF: > { %s13_s12 = sadd.s32 1, %s634_s12  }
 0x1a5   : > { %p10_p4 = scmp.ge.s32.totalorder %s13_s12, 4  }
 0x1a7   :  { %12 = sbr.rel (!%p10_p4) target bundleno = 1 (0x1), region = 62 }

// kernel: generator_forward.18
= control target key start
LH: loop header
LB: loop body
LE: loop exit
PB: predicated region body
PF: predicated region fallthrough
CT: control target
= control target key end

     0   :  { %s519_s12 = smov 0   ;;  %s563_s0 = inlined_call_operand.vmem [shape: bf16[2,144,256], index: 0, kind: input, shape index: {}]   ;;  %s564_s1 = inlined_call_operand.vmem [shape: bf16[8,144], index: 1, kind: input, shape index: {}]   ;;  %s565_s2 = inlined_call_operand.vmem [shape: f32[8,1], index: 2, kind: input, shape index: {}]   ;;  %s566_s3 = inlined_call_operand.vmem [shape: bf16[2,8,256], index: 3, kind: output, shape index: {}]  }
   0x1 LB: > { %s417_s13 = sadd.s32 4294967295, %s497_s12   ;;  %p421_p0 = scmp.ge.s32.totalorder %s497_s12, 1  ;;  %s497_s12 = sphi %s519_s12, %s13_s12  }
   0x2   : > { %p137_p1 = scmp.lt.s32.totalorder %s497_s12, 3 }
   0x4   : > { %p138_p2 = pnand %p421_p0, %p137_p1 }
   0x5   : > { %p161_p3 = scmp.lt.s32.totalorder (!%p138_p2), %s417_s13, 1 }
   0x6   : > { %141 = sbr.rel (%p138_p2) target bundleno = 420 (0x1a4), region = 32 }
   0xb   : > { %v172_v0 = vld [vmem:[%s564_s1] sm:$0xff]  ;;  %vm287_vm0 = vcmask 130048   ;;  %s568_s13 = smov (!%p161_p3, %s417_s13), 1 }
   0xc   : > { %v426_v1 = vcombine.high %v172_v0, %v172_v0  ;;  %s451_s15 = smul.u32 144, %s568_s13  ;;  %v425_v20 = vcombine.low %v172_v0, %v172_v0  ;;  %s449_s19 = sshll.u32 %s568_s13, 3 }
   0xd   : > { %s170_s22 = scalar_lea.vmem %s566_s3, %s449_s19 }
   0xe   : > { %445 = vmatprep.mubr.msk.bf16.mxu0 %vm287_vm0, %v426_v1  ;;  %s536_s18 = scalar_lea.vmem %s563_s0, %s451_s15 }
   0xf   : > { %v460_v2 = vld [vmem:[%s536_s18 + $0x74] ss:$8 sps:$4 sm:$0xff]   ;;  %v462_v3 = vld [vmem:[%s536_s18 + $0x70] ss:$8 sps:$4 sm:$0xff]   ;;  %v463_v4 = vld [vmem:[%s536_s18 + $0x64] ss:$8 sps:$4 sm:$0xff]  }
  0x10   : > { %291 = vmatprep.subr.bf16.mxu0 %v460_v2  ;;  %v465_v5 = vld [vmem:[%s536_s18 + $0x60] ss:$8 sps:$4 sm:$0xff]   ;;  %v466_v6 = vld [vmem:[%s536_s18 + $0x54] ss:$8 sps:$4 sm:$0xff]   ;;  %v468_v7 = vld [vmem:[%s536_s18 + $0x50] ss:$8 sps:$4 sm:$0xff]  }
  0x11   : > { %292 = vmatpush1.bf16.msra.mxu0 %v462_v3  ;;  %v469_v8 = vld [vmem:[%s536_s18 + $0x44] ss:$8 sps:$4 sm:$0xff]   ;;  %v471_v9 = vld [vmem:[%s536_s18 + $0x40] ss:$8 sps:$4 sm:$0xff]   ;;  %v472_v10 = vld [vmem:[%s536_s18 + $0x34] ss:$8 sps:$4 sm:$0xff]  }
  0x12   : > { %293 = vmatprep.subr.bf16.mxu0 %v463_v4  ;;  %v474_v11 = vld [vmem:[%s536_s18 + $0x30] ss:$8 sps:$4 sm:$0xff]   ;;  %v475_v12 = vld [vmem:[%s536_s18 + $0x24] ss:$8 sps:$4 sm:$0xff]   ;;  %v477_v13 = vld [vmem:[%s536_s18 + $0x20] ss:$8 sps:$4 sm:$0xff]  }
  0x13   : > { %v478_v14 = vld [vmem:[%s536_s18 + $0x14] ss:$8 sps:$4 sm:$0xff]   ;;  %v480_v15 = vld [vmem:[%s536_s18 + $0x10] ss:$8 sps:$4 sm:$0xff]   ;;  %v481_v16 = vld [vmem:[%s536_s18 + $0x4] ss:$8 sps:$4 sm:$0xff]  }
  0x14   : > { %v483_v17 = vld [vmem:[%s536_s18] ss:$8 sps:$4 sm:$0xff]   ;;  %v484_v18 = vld [vmem:[%s536_s18 + $0x84] ss:$8 sps:$4 sm:$0xff]  }
  0x15   : > { %294 = vmatpush1.bf16.msra.mxu0 %v465_v5  ;;  %v486_v19 = vld [vmem:[%s536_s18 + $0x80] ss:$8 sps:$4 sm:$0xff]  }
  0x16   : > { %295 = vmatprep.subr.bf16.mxu0 %v466_v6 }
  0x19   : > { %296 = vmatpush1.bf16.msra.mxu0 %v468_v7 }
  0x1a   : > { %297 = vmatprep.subr.bf16.mxu0 %v469_v8 }
  0x1d   : > { %298 = vmatpush1.bf16.msra.mxu0 %v471_v9 }
  0x1e   : > { %299 = vmatprep.subr.bf16.mxu0 %v472_v10 }
  0x21   : > { %300 = vmatpush1.bf16.msra.mxu0 %v474_v11 }
  0x22   : > { %301 = vmatprep.subr.bf16.mxu0 %v475_v12 }
  0x25   : > { %302 = vmatpush1.bf16.msra.mxu0 %v477_v13 }
  0x26   : > { %303 = vmatprep.subr.bf16.mxu0 %v478_v14 }
  0x29   : > { %304 = vmatpush1.bf16.msra.mxu0 %v480_v15 }
  0x2a   : > { %305 = vmatprep.subr.bf16.mxu0 %v481_v16 }
  0x2d   : > { %306 = vmatpush1.bf16.msra.mxu0 %v483_v17 }
  0x2e   : > { %321 = vmatprep.subr.bf16.mxu0 %v484_v18 }
  0x31   : > { %322 = vmatpush2.bf16.msra.mxu0 %v486_v19 }
  0x34   : > { %324 = vmatmul.mubr.bf16.vlgmr.msra.gmra.mxu0 %v425_v20 }
  0xf4   : > { %v325_v21 = vpop.f32.mrf.mxu0 }
  0xf5   : > { %v335_v26 = vmul.f32 %v325_v21, %v325_v21 }
  0xf6   : > { %v327_v22 = vpop.f32.mrf.mxu0 }
  0xf7   : > { %v332_v23 = vadd.f32 %v327_v22, %v325_v21  ;;  %v336_v24 = vmul.f32 %v327_v22, %v327_v22 }
  0xf8   : > { %v329_v25 = vpop.f32.mrf.mxu0 }
  0xf9   : > { %333 = vadd.xlane.f32.xlu0 %v332_v23  ;;  %v337_v28 = vadd.f32 %v336_v24, %v335_v26 }
  0xfa   : > { %v330_v27 = vpop.f32.mrf.mxu0 }
  0xfd   : > { %338 = vadd.xlane.f32.xlu0 %v337_v28 }
 0x182   : > { %v334_v29 = vpop.xlane.xlu0 %333 }
 0x183   : > { %v340_v30 = vmul.f32 0.00390625, %v334_v29 }
 0x185   : > { %v342_v32 = vmul.f32 %v340_v30, %v340_v30  ;;  %v345_v37 = vsub.f32 %v325_v21, %v340_v30  ;;  %v346_v38 = vsub.f32 %v327_v22, %v340_v30 }
 0x186   : > { %v339_v31 = vpop.xlane.xlu0 %338 }
 0x187   : > { %v341_v33 = vmul.f32 0.00390625, %v339_v31 }
 0x189   : > { %v343_v34 = vsub.f32 %v341_v33, %v342_v32 }
 0x18b   : > { %v344_v35 = vmax.f32 %v343_v34, 0.0 }
 0x18d   : > { %v347_v36 = vadd.f32 1e-05, %v344_v35 }
 0x18f   : > { %489 = vrsqrt.f32 %v347_v36 }
 0x19c   : > { %v490_v39 = vpop.eup %489 }
 0x19d   : > { %v349_v40 = vmul.f32 %v490_v39, %v345_v37  ;;  %v350_v41 = vmul.f32 %v490_v39, %v346_v38 }
 0x19f   : > { %v351_v42 = vmax.f32 %v349_v40, 0.0  ;;  %v352_v43 = vmax.f32 %v350_v41, 0.0 }
 0x1a1   : > { %v450_v44 = vpack.c.bf16 %v352_v43, %v351_v42 }
 0x1a3   : > { %361 = vst [vmem:[%s170_s22] sm:$0xff] %v450_v44 }
 0x1a4 PF: > { %s13_s12 = sadd.s32 1, %s497_s12  }
 0x1a5   : > { %p10_p4 = scmp.ge.s32.totalorder %s13_s12, 4  }
 0x1a7   :  { %12 = sbr.rel (!%p10_p4) target bundleno = 1 (0x1), region = 62 }

// kernel: generator_forward.19
= control target key start
LH: loop header
LB: loop body
LE: loop exit
PB: predicated region body
PF: predicated region fallthrough
CT: control target
= control target key end

     0   :  { %s827_s12 = smov 0   ;;  %s921_s0 = inlined_call_operand.vmem [shape: bf16[2,400,256], index: 0, kind: input, shape index: {}]   ;;  %s922_s1 = inlined_call_operand.vmem [shape: bf16[8,400], index: 1, kind: input, shape index: {}]   ;;  %s923_s2 = inlined_call_operand.vmem [shape: f32[8,1], index: 2, kind: input, shape index: {}]   ;;  %s924_s3 = inlined_call_operand.vmem [shape: f32[2,8,256], index: 3, kind: output, shape index: {}]  }
   0x1 LB: > { %s638_s13 = sadd.s32 4294967295, %s804_s12   ;;  %p642_p0 = scmp.ge.s32.totalorder %s804_s12, 1  ;;  %s804_s12 = sphi %s827_s12, %s13_s12  }
   0x2   : > { %p137_p1 = scmp.lt.s32.totalorder %s804_s12, 3 }
   0x4   : > { %p138_p2 = pnand %p642_p0, %p137_p1 }
   0x5   : > { %p161_p3 = scmp.lt.s32.totalorder (!%p138_p2), %s638_s13, 1 }
   0x6   : > { %141 = sbr.rel (%p138_p2) target bundleno = 294 (0x126), region = 32 }
   0xb   : > { %v838_v0 = vld [vmem:[%s922_s1 + $0x8] sm:$0xff]  ;;  %vm493_vm0 = vcmask 130048   ;;  %v843_v1 = vld [vmem:[%s922_s1] sm:$0xff]  ;;  %v806_v5 = vmov 0   ;;  %s926_s13 = smov (!%p161_p3, %s638_s13), 1 }
   0xc   : > { %v224_v2 = vld [vmem:[%s923_s2] sm:$0xff]  ;;  %v649_v3 = vcombine.high %v838_v0, %v838_v0  ;;  %v647_v4 = vcombine.high %v843_v1, %v843_v1  ;;  %714 = vset.pattern.permute.xlu0 %v806_v5  ;;  %s704_s20 = smul.u32 400, %s926_s13  ;;  %v648_v48 = vcombine.low %v838_v0, %v838_v0  ;;  %v646_v57 = vcombine.low %v843_v1, %v843_v1  ;;  %s703_s24 = sshll.u32 %s926_s13, 4 }
   0xd   : > { %227 = vperm.xlu0 %714, %v224_v2   ;;  %s170_s27 = scalar_lea.vmem %s924_s3, %s703_s24 }
   0xe   : > { %700 = vmatprep.mubr.msk.bf16.mxu1 %vm493_vm0, %v649_v3  ;;  %529 = vmatprep.mubr.bf16.mxu0 %v647_v4  ;;  %s858_s23 = scalar_lea.vmem %s921_s0, %s704_s20 }
   0xf   : > { %v715_v6 = vld [vmem:[%s858_s23 + $0x74] ss:$8 sps:$4 sm:$0xff]   ;;  %v717_v7 = vld [vmem:[%s858_s23 + $0x70] ss:$8 sps:$4 sm:$0xff]   ;;  %v718_v8 = vld [vmem:[%s858_s23 + $0x64] ss:$8 sps:$4 sm:$0xff]  }
  0x10   : > { %497 = vmatprep.subr.bf16.mxu0 %v715_v6  ;;  %v720_v9 = vld [vmem:[%s858_s23 + $0x60] ss:$8 sps:$4 sm:$0xff]   ;;  %v721_v10 = vld [vmem:[%s858_s23 + $0x54] ss:$8 sps:$4 sm:$0xff]   ;;  %v723_v11 = vld [vmem:[%s858_s23 + $0x50] ss:$8 sps:$4 sm:$0xff]  }
  0x11   : > { %498 = vmatpush1.bf16.msra.mxu0 %v717_v7  ;;  %v724_v12 = vld [vmem:[%s858_s23 + $0x44] ss:$8 sps:$4 sm:$0xff]   ;;  %v735_v13 = vld [vmem:[%s858_s23 + $0x174] ss:$8 sps:$4 sm:$0xff]   ;;  %v738_v14 = vld [vmem:[%s858_s23 + $0x170] ss:$8 sps:$4 sm:$0xff]  }
  0x12   : > { %499 = vmatprep.subr.bf16.mxu0 %v718_v8  ;;  %v726_v15 = vld [vmem:[%s858_s23 + $0x40] ss:$8 sps:$4 sm:$0xff]   ;;  %538 = vmatprep.subr.bf16.mxu1 %v735_v13  ;;  %v727_v16 = vld [vmem:[%s858_s23 + $0x34] ss:$8 sps:$4 sm:$0xff]   ;;  %v741_v17 = vld [vmem:[%s858_s23 + $0x164] ss:$8 sps:$4 sm:$0xff]  }
  0x13   : > { %539 = vmatpush1.bf16.msra.mxu1 %v738_v14  ;;  %v744_v18 = vld [vmem:[%s858_s23 + $0x160] ss:$8 sps:$4 sm:$0xff]   ;;  %v729_v19 = vld [vmem:[%s858_s23 + $0x30] ss:$8 sps:$4 sm:$0xff]   ;;  %v730_v20 = vld [vmem:[%s858_s23 + $0x24] ss:$8 sps:$4 sm:$0xff]  }
  0x14   : > { %540 = vmatprep.subr.bf16.mxu1 %v741_v17  ;;  %v747_v21 = vld [vmem:[%s858_s23 + $0x154] ss:$8 sps:$4 sm:$0xff]   ;;  %v750_v22 = vld [vmem:[%s858_s23 + $0x150] ss:$8 sps:$4 sm:$0xff]   ;;  %v753_v23 = vld [vmem:[%s858_s23 + $0x144] ss:$8 sps:$4 sm:$0xff]  }
  0x15   : > { %500 = vmatpush1.bf16.msra.mxu0 %v720_v9  ;;  %v732_v24 = vld [vmem:[%s858_s23 + $0x20] ss:$8 sps:$4 sm:$0xff]   ;;  %v733_v25 = vld [vmem:[%s858_s23 + $0x14] ss:$8 sps:$4 sm:$0xff]   ;;  %v737_v28 = vld [vmem:[%s858_s23 + $0x10] ss:$8 sps:$4 sm:$0xff]  }
  0x16   : > { %501 = vmatprep.subr.bf16.mxu0 %v721_v10  ;;  %v756_v26 = vld [vmem:[%s858_s23 + $0x140] ss:$8 sps:$4 sm:$0xff]   ;;  %v759_v27 = vld [vmem:[%s858_s23 + $0x134] ss:$8 sps:$4 sm:$0xff]   ;;  %v739_v29 = vld [vmem:[%s858_s23 + $0x4] ss:$8 sps:$4 sm:$0xff]  }
  0x17   : > { %541 = vmatpush1.bf16.msra.mxu1 %v744_v18  ;;  %v762_v30 = vld [vmem:[%s858_s23 + $0x130] ss:$8 sps:$4 sm:$0xff]   ;;  %v765_v31 = vld [vmem:[%s858_s23 + $0x124] ss:$8 sps:$4 sm:$0xff]   ;;  %v743_v32 = vld [vmem:[%s858_s23] ss:$8 sps:$4 sm:$0xff]  }
  0x18   : > { %542 = vmatprep.subr.bf16.mxu1 %v747_v21  ;;  %v745_v33 = vld [vmem:[%s858_s23 + $0xf4] ss:$8 sps:$4 sm:$0xff]   ;;  %v768_v34 = vld [vmem:[%s858_s23 + $0x120] ss:$8 sps:$4 sm:$0xff]   ;;  %v749_v36 = vld [vmem:[%s858_s23 + $0xf0] ss:$8 sps:$4 sm:$0xff]  }
  0x19   : > { %502 = vmatpush1.bf16.msra.mxu0 %v723_v11  ;;  %v771_v35 = vld [vmem:[%s858_s23 + $0x114] ss:$8 sps:$4 sm:$0xff]   ;;  %v751_v37 = vld [vmem:[%s858_s23 + $0xe4] ss:$8 sps:$4 sm:$0xff]   ;;  %v774_v38 = vld [vmem:[%s858_s23 + $0x110] ss:$8 sps:$4 sm:$0xff]  }
  0x1a   : > { %503 = vmatprep.subr.bf16.mxu0 %v724_v12  ;;  %v777_v39 = vld [vmem:[%s858_s23 + $0x104] ss:$8 sps:$4 sm:$0xff]   ;;  %v755_v40 = vld [vmem:[%s858_s23 + $0xe0] ss:$8 sps:$4 sm:$0xff]   ;;  %v757_v41 = vld [vmem:[%s858_s23 + $0xd4] ss:$8 sps:$4 sm:$0xff]  }
  0x1b   : > { %543 = vmatpush1.bf16.msra.mxu1 %v750_v22  ;;  %v780_v42 = vld [vmem:[%s858_s23 + $0x100] ss:$8 sps:$4 sm:$0xff]   ;;  %v783_v43 = vld [vmem:[%s858_s23 + $0x184] ss:$8 sps:$4 sm:$0xff]   ;;  %v761_v44 = vld [vmem:[%s858_s23 + $0xd0] ss:$8 sps:$4 sm:$0xff]  }
  0x1c   : > { %544 = vmatprep.subr.bf16.mxu1 %v753_v23  ;;  %v763_v45 = vld [vmem:[%s858_s23 + $0xc4] ss:$8 sps:$4 sm:$0xff]   ;;  %v786_v46 = vld [vmem:[%s858_s23 + $0x180] ss:$8 sps:$4 sm:$0xff]   ;;  %v769_v49 = vld [vmem:[%s858_s23 + $0xb4] ss:$8 sps:$4 sm:$0xff]  }
  0x1d   : > { %504 = vmatpush1.bf16.msra.mxu0 %v726_v15  ;;  %v767_v47 = vld [vmem:[%s858_s23 + $0xc0] ss:$8 sps:$4 sm:$0xff]   ;;  %v773_v50 = vld [vmem:[%s858_s23 + $0xb0] ss:$8 sps:$4 sm:$0xff]   ;;  %v775_v51 = vld [vmem:[%s858_s23 + $0xa4] ss:$8 sps:$4 sm:$0xff]  }
  0x1e   : > { %505 = vmatprep.subr.bf16.mxu0 %v727_v16  ;;  %v779_v52 = vld [vmem:[%s858_s23 + $0xa0] ss:$8 sps:$4 sm:$0xff]   ;;  %v781_v53 = vld [vmem:[%s858_s23 + $0x94] ss:$8 sps:$4 sm:$0xff]   ;;  %v785_v54 = vld [vmem:[%s858_s23 + $0x90] ss:$8 sps:$4 sm:$0xff]  }
  0x1f   : > { %545 = vmatpush1.bf16.msra.mxu1 %v756_v26  ;;  %v789_v55 = vld [vmem:[%s858_s23 + $0x84] ss:$8 sps:$4 sm:$0xff]   ;;  %v791_v56 = vld [vmem:[%s858_s23 + $0x80] ss:$8 sps:$4 sm:$0xff]  }
  0x20   : > { %546 = vmatprep.subr.bf16.mxu1 %v759_v27 }
  0x21   : > { %506 = vmatpush1.bf16.msra.mxu0 %v729_v19 }
  0x22   : > { %507 = vmatprep.subr.bf16.mxu0 %v730_v20 }
  0x23   : > { %547 = vmatpush1.bf16.msra.mxu1 %v762_v30 }
  0x24   : > { %548 = vmatprep.subr.bf16.mxu1 %v765_v31 }
  0x25   : > { %508 = vmatpush1.bf16.msra.mxu0 %v732_v24 }
  0x26   : > { %509 = vmatprep.subr.bf16.mxu0 %v733_v25 }
  0x27   : > { %549 = vmatpush1.bf16.msra.mxu1 %v768_v34 }
  0x28   : > { %550 = vmatprep.subr.bf16.mxu1 %v771_v35 }
  0x29   : > { %510 = vmatpush1.bf16.msra.mxu0 %v737_v28 }
  0x2a   : > { %511 = vmatprep.subr.bf16.mxu0 %v739_v29 }
  0x2b   : > { %551 = vmatpush1.bf16.msra.mxu1 %v774_v38 }
  0x2c   : > { %552 = vmatprep.subr.bf16.mxu1 %v777_v39 }
  0x2d   : > { %512 = vmatpush1.bf16.msra.mxu0 %v743_v32 }
  0x2e   : > { %513 = vmatprep.subr.bf16.mxu0 %v745_v33 }
  0x2f   : > { %553 = vmatpush1.bf16.msra.mxu1 %v780_v42 }
  0x30   : > { %568 = vmatprep.subr.bf16.mxu1 %v783_v43 }
  0x31   : > { %514 = vmatpush2.bf16.msra.mxu0 %v749_v36 }
  0x32   : > { %515 = vmatprep.subr.bf16.mxu0 %v751_v37 }
  0x33   : > { %569 = vmatpush2.bf16.msra.mxu1 %v786_v46 }
  0x35   : > { %516 = vmatpush2.bf16.msra.mxu0 %v755_v40 }
  0x36   : > { %517 = vmatprep.subr.bf16.mxu0 %v757_v41  ;;  %571 = vmatmul.mubr.bf16.vlgmr.msra.gmra.mxu1 %v648_v48 }
  0x39   : > { %518 = vmatpush2.bf16.msra.mxu0 %v761_v44 }
  0x3a   : > { %519 = vmatprep.subr.bf16.mxu0 %v763_v45 }
  0x3d   : > { %520 = vmatpush2.bf16.msra.mxu0 %v767_v47 }
  0x3e   : > { %521 = vmatprep.subr.bf16.mxu0 %v769_v49 }
  0x41   : > { %522 = vmatpush2.bf16.msra.mxu0 %v773_v50 }
  0x42   : > { %523 = vmatprep.subr.bf16.mxu0 %v775_v51 }
  0x45   : > { %524 = vmatpush2.bf16.msra.mxu0 %v779_v52 }
  0x46   : > { %525 = vmatprep.subr.bf16.mxu0 %v781_v53 }
  0x49   : > { %526 = vmatpush2.bf16.msra.mxu0 %v785_v54 }
  0x4a   : > { %527 = vmatprep.subr.bf16.mxu0 %v789_v55 }
  0x4d   : > { %528 = vmatpush2.bf16.msra.mxu0 %v791_v56 }
  0x50   : > { %530 = vmatmul.mubr.bf16.vlgmr.msra.gmra.mxu0 %v646_v57 }
  0x88   : > { %v228_v62 = vpop.permute.xlu0 %227 }
  0xf6   : > { %v572_v58 = vpop.f32.mrf.mxu1 }
  0xf8   : > { %v574_v59 = vpop.f32.mrf.mxu1 }
  0xfa   : > { %v576_v60 = vpop.f32.mrf.mxu1 }
  0xfc   : > { %v577_v61 = vpop.f32.mrf.mxu1 }
 0x110   : > { %v531_v63 = vpop.f32.mrf.mxu0 }
 0x111   : > { %v532_v0 = vadd.f32 %v531_v63, %v228_v62 }
 0x112   : > { %v533_v2 = vpop.f32.mrf.mxu0 }
 0x113   : > { %v573_v3 = vadd.f32 %v572_v58, %v532_v0  ;;  %v534_v4 = vadd.f32 %v533_v2, %v228_v62 }
 0x114   : > { %v535_v5 = vpop.f32.mrf.mxu0 }
 0x115   : > { %794 = vtanh.f32 %v573_v3  ;;  %v575_v6 = vadd.f32 %v574_v59, %v534_v4 }
 0x116   : > { %v536_v7 = vpop.f32.mrf.mxu0 }
 0x117   : > { %796 = vtanh.f32 %v575_v6 }
 0x122   : > { %v795_v1 = vpop.eup %794 }
 0x123   : > { %581 = vst [vmem:[%s170_s27] sm:$0xff] %v795_v1 }
 0x124   : > { %v797_v8 = vpop.eup %796 }
 0x125   : > { %582 = vst [vmem:[%s170_s27 + $0x8] sm:$0xff] %v797_v8 }
 0x126 PF: > { %s13_s12 = sadd.s32 1, %s804_s12  }
 0x127   : > { %p10_p4 = scmp.ge.s32.totalorder %s13_s12, 4  }
 0x129   :  { %12 = sbr.rel (!%p10_p4) target bundleno = 1 (0x1), region = 62 }

</bundles_post_ra>
